<compile_context>
chip_gen: v5e
topology: v5e:2x2
jax: 0.10.0
libtpu: 0.0.40
codegen_flags: <defaults>
</compile_context>

<pallas_src>
import functools
import math

import jax
import jax.numpy as jnp
from jax.experimental import pallas as pl
from jax.experimental.pallas import tpu as pltpu

LANES = 128
SUBLANES = 8
ROW_ALIGN = 32              # tiled-block row granularity legal for f32 / bf16 / int8
MAX_TILE_ROWS = 2048        # 2048 x 128 x 4B = 1 MiB per f32 stream per buffer
VMEM_LIMIT_BYTES = 32 * 1024 * 1024
L2_PALLAS_MIN_ELEMS = 128 * 1024   # below this a Pallas launch costs more than jnp


def _cdiv(a, b):
    return -(-a // b)


def _round_up(a, b):
    return _cdiv(a, b) * b


@functools.lru_cache(maxsize=None)
def _num_tensorcores():
    """Best-effort: 2 TensorCores per chip on v7x, 1 on v5e/v6e."""
    try:
        kind = jax.devices()[0].device_kind.lower()
    except Exception:
        return 1
    return 2 if "v7" in kind else 1


def _loss_plan(n, nsplit):
    """Returns (nsplit, tile_rows, steps, padded_rows); prefers zero-pad layouts."""
    rows = _cdiv(n, LANES)
    if nsplit > 1 and rows < nsplit * ROW_ALIGN:
        nsplit = 1
    align = SUBLANES if nsplit == 1 else ROW_ALIGN
    # Path 1: exact fit (no pad copy), one block per core split.
    if (n % LANES == 0 and rows % (nsplit * align) == 0
            and rows // nsplit <= MAX_TILE_ROWS):
        return nsplit, rows // nsplit, 1, rows
    # Path 2: general tiled path; pads only when the shape is ragged.
    rows_per_core = _cdiv(rows, nsplit)
    steps = max(1, _cdiv(rows_per_core, MAX_TILE_ROWS))
    tile_rows = _round_up(_cdiv(rows_per_core, steps), ROW_ALIGN)
    return nsplit, tile_rows, steps, nsplit * steps * tile_rows


def _sumsq_plan(n):
    rows = _cdiv(n, LANES)
    if n % LANES == 0 and rows % SUBLANES == 0 and rows <= MAX_TILE_ROWS:
        return rows, 1, rows
    steps = max(1, _cdiv(rows, MAX_TILE_ROWS))
    tile_rows = _round_up(_cdiv(rows, steps), ROW_ALIGN)
    return tile_rows, steps, steps * tile_rows


def _to_slab(x, padded_rows):
    """Flatten x into a lane-dense (padded_rows, 128) slab; pad only if ragged."""
    flat = x.reshape(-1)
    pad = padded_rows * LANES - flat.shape[0]
    if pad:
        flat = jnp.pad(flat, (0, pad))         # only on ragged element counts
    return flat.reshape(padded_rows, LANES)


# ---------------------------------------------------------------------------
# Kernel 1: fused BCE-with-logits + dice statistics, tiled reduction.
# Output block (4, 8, 128) per core split:
#   [0] sum(bce), [1] sum(sig*t), [2] sum(sig), [3] sum(t)
# ---------------------------------------------------------------------------
def _loss_tile_kernel(pred_ref, tgt_ref, acc_ref):
    step = pl.program_id(1)

    @pl.when(step == 0)
    def _init():
        acc_ref[...] = jnp.zeros_like(acc_ref)

    x = pred_ref[...].astype(jnp.float32)
    t = tgt_ref[...].astype(jnp.float32)
    tile_rows, lanes = x.shape

    # One exp shared by the numerically-stable BCE and the sigmoid.
    e = jnp.exp(-jnp.abs(x))
    bce = jnp.maximum(x, 0.0) - x * t + jnp.log(1.0 + e)
    d = 1.0 + e
    r = pl.reciprocal(d, approx=True)     # EUP slot (otherwise idle)
    r = r * (2.0 - d * r)                 # one Newton step -> ~full f32 precision
    sig = jnp.where(x >= 0.0, 1.0, e) * r

    # Fold (tile_rows, 128) -> (8, 128) with pure VPU adds; the tiny cross-lane
    # reduction of the partials happens once, outside the kernel.
    g = tile_rows // SUBLANES

    def fold(v):
        return v.reshape(g, SUBLANES, lanes).sum(axis=0)

    acc_ref[0] += fold(bce)
    acc_ref[1] += fold(sig * t)
    acc_ref[2] += fold(sig)
    acc_ref[3] += fold(t)


def _loss_sums(pred, target):
    n = pred.size
    nsplit, tile_rows, steps, padded_rows = _loss_plan(n, _num_tensorcores())

    tgt = target
    if tgt.dtype == jnp.bool_ or jnp.issubdtype(tgt.dtype, jnp.integer):
        # Stream binary targets as bf16 (2x less HBM traffic than f32).
        tgt = tgt.astype(jnp.bfloat16)

    pred_slab = _to_slab(pred, padded_rows)
    tgt_slab = _to_slab(tgt, padded_rows)

    if nsplit > 1:
        dim_sem = (getattr(pltpu, "CORE_PARALLEL", pltpu.PARALLEL), pltpu.ARBITRARY)
    else:
        dim_sem = (pltpu.ARBITRARY, pltpu.ARBITRARY)

    partials = pl.pallas_call(
        _loss_tile_kernel,
        out_shape=jax.ShapeDtypeStruct((nsplit * 4, SUBLANES, LANES), jnp.float32),
        grid=(nsplit, steps),
        in_specs=[
            pl.BlockSpec((tile_rows, LANES), lambda c, i: (c * steps + i, 0)),
            pl.BlockSpec((tile_rows, LANES), lambda c, i: (c * steps + i, 0)),
        ],
        out_specs=pl.BlockSpec((4, SUBLANES, LANES), lambda c, i: (c, 0, 0)),
        compiler_params=pltpu.CompilerParams(
            dimension_semantics=dim_sem,
            vmem_limit_bytes=VMEM_LIMIT_BYTES),
    )(pred_slab, tgt_slab)

    # (nsplit*4, 8, 128) -> (4,) : tiny XLA reduction of the per-core partials.
    sums = partials.reshape(nsplit, 4, SUBLANES, LANES).sum(axis=(0, 2, 3))

    pad_count = padded_rows * LANES - n
    if pad_count:
        # Zero padding contributes exactly ln(2)/elem to the BCE sum and
        # 0.5/elem to the sigmoid sum; target-weighted sums are already exact.
        sums = sums - jnp.array(
            [math.log(2.0) * pad_count, 0.0, 0.5 * pad_count, 0.0], jnp.float32)
    return sums


# ---------------------------------------------------------------------------
# Kernel 2: tiled sum of squares for LARGE parameters (0^2 == 0 -> no mask).
# ---------------------------------------------------------------------------
def _sumsq_tile_kernel(p_ref, acc_ref):
    @pl.when(pl.program_id(0) == 0)
    def _init():
        acc_ref[...] = jnp.zeros_like(acc_ref)

    v = p_ref[...].astype(jnp.float32)
    g = v.shape[0] // SUBLANES
    acc_ref[...] += (v * v).reshape(g, SUBLANES, v.shape[1]).sum(axis=0)


def _sum_squares(p):
    tile_rows, steps, padded_rows = _sumsq_plan(p.size)
    slab = _to_slab(p, padded_rows)
    part = pl.pallas_call(
        _sumsq_tile_kernel,
        out_shape=jax.ShapeDtypeStruct((SUBLANES, LANES), jnp.float32),
        grid=(steps,),
        in_specs=[pl.BlockSpec((tile_rows, LANES), lambda i: (i, 0))],
        out_specs=pl.BlockSpec((SUBLANES, LANES), lambda i: (0, 0)),
        compiler_params=pltpu.CompilerParams(
            dimension_semantics=(pltpu.ARBITRARY,),
            vmem_limit_bytes=VMEM_LIMIT_BYTES),
    )(slab)
    return jnp.sum(part)


# ---------------------------------------------------------------------------
# Public wrapper reproducing CombinedLoss_with_w.forward(pred, target, model)
# (model.parameters() is represented as an explicit list of arrays).
# ---------------------------------------------------------------------------
@functools.partial(jax.jit, static_argnames=("alpha", "beta"))
def combined_loss_with_w(pred, target, params, alpha=0.5, beta=0.005):
    sums = _loss_sums(pred, target)
    n_elem = jnp.float32(pred.size)

    bce_loss = sums[0] / n_elem                                     # BCEWithLogits (mean)
    dice_loss = 1.0 - (2.0 * sums[1] + 1.0) / (sums[2] + sums[3] + 1.0)

    l2_penalty = jnp.float32(0.0)
    small_sq = jnp.float32(0.0)
    for p in params:
        if p.size >= L2_PALLAS_MIN_ELEMS:
            l2_penalty = l2_penalty + _sum_squares(p)
        else:                                   # tiny params: one fused jnp reduce
            small_sq = small_sq + jnp.sum(jnp.square(p.astype(jnp.float32)))
    l2_penalty = l2_penalty + small_sq

    return alpha * bce_loss + (1.0 - alpha) * dice_loss + beta * l2_penalty


def _reference(pred, target, params, alpha=0.5, beta=0.005):
    """Pure-JAX reference mirroring the PyTorch forward."""
    x = pred.astype(jnp.float32)
    t = target.astype(jnp.float32)
    bce = jnp.mean(jnp.maximum(x, 0.0) - x * t + jnp.log1p(jnp.exp(-jnp.abs(x))))
    s = jax.nn.sigmoid(x)
    dice = 1.0 - (2.0 * jnp.sum(s * t) + 1.0) / (jnp.sum(s) + jnp.sum(t) + 1.0)
    l2 = sum(jnp.sum(jnp.square(p.astype(jnp.float32))) for p in params)
    return alpha * bce + (1.0 - alpha) * dice + beta * l2


if __name__ == "__main__":
    key = jax.random.PRNGKey(0)
    keys = jax.random.split(key, 10)

    # --- Case 1: module-spec shapes (NCHW segmentation logits / binary target). ---
    N, C, H, W = 2, 4, 16, 16
    pred = jax.random.normal(keys[0], (N, C, H, W), dtype=jnp.float32)
    target = (jax.random.uniform(keys[1], (N, C, H, W)) > 0.5).astype(jnp.float32)
    params = [
        0.1 * jax.random.normal(keys[2], (8, 4, 3, 3), dtype=jnp.float32),   # jnp L2 path
        0.1 * jax.random.normal(keys[3], (8,), dtype=jnp.float32),           # jnp L2 path
        0.02 * jax.random.normal(keys[4], (256, 1024), dtype=jnp.float32),   # Pallas L2 path
        0.1 * jax.random.normal(keys[5], (16,), dtype=jnp.float32),          # jnp L2 path
    ]
    loss = jax.block_until_ready(combined_loss_with_w(pred, target, params))
    ref = _reference(pred, target, params)
    assert jnp.allclose(loss, ref, rtol=1e-3, atol=1e-4), (loss, ref)

    # --- Case 2: multi-step tiled path (rows > MAX_TILE_ROWS), bool target (bf16 stream). ---
    pred2 = jax.random.normal(keys[6], (1, 1, 512, 768), dtype=jnp.float32)
    target2 = jax.random.uniform(keys[7], (1, 1, 512, 768)) > 0.5
    loss2 = jax.block_until_ready(
        combined_loss_with_w(pred2, target2, [], alpha=0.3, beta=0.0))
    ref2 = _reference(pred2, target2, [], alpha=0.3, beta=0.0)
    assert jnp.allclose(loss2, ref2, rtol=1e-3, atol=1e-4), (loss2, ref2)

    # --- Case 3: ragged element count exercising zero-pad + analytic correction. ---
    pred3 = jax.random.normal(keys[8], (2, 3, 25, 25), dtype=jnp.float32)
    target3 = (jax.random.uniform(keys[9], (2, 3, 25, 25)) > 0.5).astype(jnp.float32)
    loss3 = jax.block_until_ready(combined_loss_with_w(pred3, target3, params))
    ref3 = _reference(pred3, target3, params)
    assert jnp.allclose(loss3, ref3, rtol=1e-3, atol=1e-4), (loss3, ref3)

    print("KERNEL_OK")
</pallas_src>

<mosaic_0001>
module attributes {stable_mosaic.version = 11 : i64} {
  func.func @_loss_tile_kernel(%arg0: i32, %arg1: i32, %arg2: memref<16x128xf32, #tpu.memory_space<vmem>>, %arg3: memref<16x128xf32, #tpu.memory_space<vmem>>, %arg4: memref<4x8x128xf32, #tpu.memory_space<vmem>>) attributes {dimension_semantics = [#tpu.dimension_semantics<arbitrary>, #tpu.dimension_semantics<arbitrary>], iteration_bounds = array<i64: 1, 1>, scalar_prefetch = 0 : i64, scratch_operands = 0 : i64, tpu.core_type = #tpu.core_type<tc>, window_params = [{transform_indices = @transform_0, window_bounds = array<i64: 16, 128>}, {transform_indices = @transform_1, window_bounds = array<i64: 16, 128>}, {transform_indices = @transform_2, window_bounds = array<i64: 4, 8, 128>}]} {
    %c0_i32 = arith.constant 0 : i32
    %0 = arith.cmpi eq, %arg1, %c0_i32 : i32
    %1 = arith.extui %0 : i1 to i32
    %c0_i32_0 = arith.constant 0 : i32
    %2 = arith.cmpi ne, %1, %c0_i32_0 : i32
    scf.if %2 {
      %cst_35 = arith.constant 0.000000e+00 : f32
      %62 = vector.broadcast %cst_35 : f32 to vector<4x8x128xf32>
      %c0_36 = arith.constant 0 : index
      %c0_37 = arith.constant 0 : index
      %c0_38 = arith.constant 0 : index
      %63 = vector.load %arg4[%c0_36, %c0_37, %c0_38] : memref<4x8x128xf32, #tpu.memory_space<vmem>>, vector<4x8x128xf32>
      tpu.vector_store %arg4[%c0_36, %c0_37, %c0_38], %62 {strides = array<i32>} : memref<4x8x128xf32, #tpu.memory_space<vmem>>, vector<4x8x128xf32>,
    } else {
    }
    %c0 = arith.constant 0 : index
    %c0_1 = arith.constant 0 : index
    %3 = vector.load %arg2[%c0, %c0_1] : memref<16x128xf32, #tpu.memory_space<vmem>>, vector<16x128xf32>
    %c0_2 = arith.constant 0 : index
    %c0_3 = arith.constant 0 : index
    %4 = vector.load %arg3[%c0_2, %c0_3] : memref<16x128xf32, #tpu.memory_space<vmem>>, vector<16x128xf32>
    %5 = math.absf %3 : vector<16x128xf32>
    %cst = arith.constant 0.000000e+00 : f32
    %6 = vector.broadcast %cst : f32 to vector<16x128xf32>
    %7 = arith.subf %6, %5 : vector<16x128xf32>
    %8 = math.exp %7 : vector<16x128xf32>
    %cst_4 = arith.constant 0.000000e+00 : f32
    %9 = vector.broadcast %cst_4 : f32 to vector<16x128xf32>
    %10 = arith.maximumf %3, %9 : vector<16x128xf32>
    %11 = arith.mulf %3, %4 : vector<16x128xf32>
    %12 = arith.subf %10, %11 : vector<16x128xf32>
    %cst_5 = arith.constant 1.000000e+00 : f32
    %13 = vector.broadcast %cst_5 : f32 to vector<16x128xf32>
    %14 = arith.addf %13, %8 : vector<16x128xf32>
    %15 = math.log %14 : vector<16x128xf32>
    %16 = arith.addf %12, %15 : vector<16x128xf32>
    %cst_6 = arith.constant 1.000000e+00 : f32
    %17 = vector.broadcast %cst_6 : f32 to vector<16x128xf32>
    %18 = arith.addf %17, %8 : vector<16x128xf32>
    %19 = tpu.reciprocal %18 {approx = true} : vector<16x128xf32> -> vector<16x128xf32>
    %20 = arith.mulf %18, %19 : vector<16x128xf32>
    %cst_7 = arith.constant 2.000000e+00 : f32
    %21 = vector.broadcast %cst_7 : f32 to vector<16x128xf32>
    %22 = arith.subf %21, %20 : vector<16x128xf32>
    %23 = arith.mulf %19, %22 : vector<16x128xf32>
    %cst_8 = arith.constant 0.000000e+00 : f32
    %24 = vector.broadcast %cst_8 : f32 to vector<16x128xf32>
    %25 = arith.cmpf oge, %3, %24 : vector<16x128xf32>
    %cst_9 = arith.constant 1.000000e+00 : f32
    %26 = vector.broadcast %cst_9 : f32 to vector<16x128xf32>
    %27 = arith.select %25, %26, %8 : vector<16x128xi1>, vector<16x128xf32>
    %28 = arith.mulf %27, %23 : vector<16x128xf32>
    %c0_10 = arith.constant 0 : index
    %c0_11 = arith.constant 0 : index
    %c0_12 = arith.constant 0 : index
    %29 = vector.load %arg4[%c0_10, %c0_11, %c0_12] : memref<4x8x128xf32, #tpu.memory_space<vmem>>, vector<1x8x128xf32>
    %30 = vector.shape_cast %29 : vector<1x8x128xf32> to vector<8x128xf32>
    %31 = vector.shape_cast %16 : vector<16x128xf32> to vector<2x8x128xf32>
    %cst_13 = arith.constant dense<0.000000e+00> : vector<8x128xf32>
    %32 = vector.multi_reduction <add>, %31, %cst_13 [0] : vector<2x8x128xf32> to vector<8x128xf32>
    %33 = arith.addf %30, %32 : vector<8x128xf32>
    %c0_14 = arith.constant 0 : index
    %c0_15 = arith.constant 0 : index
    %c0_16 = arith.constant 0 : index
    %34 = vector.load %arg4[%c0_14, %c0_15, %c0_16] : memref<4x8x128xf32, #tpu.memory_space<vmem>>, vector<1x8x128xf32>
    %35 = vector.shape_cast %34 : vector<1x8x128xf32> to vector<8x128xf32>
    %36 = vector.shape_cast %33 : vector<8x128xf32> to vector<1x8x128xf32>
    tpu.vector_store %arg4[%c0_14, %c0_15, %c0_16], %36 {strides = array<i32>} : memref<4x8x128xf32, #tpu.memory_space<vmem>>, vector<1x8x128xf32>,
    %c1 = arith.constant 1 : index
    %c0_17 = arith.constant 0 : index
    %c0_18 = arith.constant 0 : index
    %37 = vector.load %arg4[%c1, %c0_17, %c0_18] : memref<4x8x128xf32, #tpu.memory_space<vmem>>, vector<1x8x128xf32>
    %38 = vector.shape_cast %37 : vector<1x8x128xf32> to vector<8x128xf32>
    %39 = arith.mulf %28, %4 : vector<16x128xf32>
    %40 = vector.shape_cast %39 : vector<16x128xf32> to vector<2x8x128xf32>
    %cst_19 = arith.constant dense<0.000000e+00> : vector<8x128xf32>
    %41 = vector.multi_reduction <add>, %40, %cst_19 [0] : vector<2x8x128xf32> to vector<8x128xf32>
    %42 = arith.addf %38, %41 : vector<8x128xf32>
    %c1_20 = arith.constant 1 : index
    %c0_21 = arith.constant 0 : index
    %c0_22 = arith.constant 0 : index
    %43 = vector.load %arg4[%c1_20, %c0_21, %c0_22] : memref<4x8x128xf32, #tpu.memory_space<vmem>>, vector<1x8x128xf32>
    %44 = vector.shape_cast %43 : vector<1x8x128xf32> to vector<8x128xf32>
    %45 = vector.shape_cast %42 : vector<8x128xf32> to vector<1x8x128xf32>
    tpu.vector_store %arg4[%c1_20, %c0_21, %c0_22], %45 {strides = array<i32>} : memref<4x8x128xf32, #tpu.memory_space<vmem>>, vector<1x8x128xf32>,
    %c2 = arith.constant 2 : index
    %c0_23 = arith.constant 0 : index
    %c0_24 = arith.constant 0 : index
    %46 = vector.load %arg4[%c2, %c0_23, %c0_24] : memref<4x8x128xf32, #tpu.memory_space<vmem>>, vector<1x8x128xf32>
    %47 = vector.shape_cast %46 : vector<1x8x128xf32> to vector<8x128xf32>
    %48 = vector.shape_cast %28 : vector<16x128xf32> to vector<2x8x128xf32>
    %cst_25 = arith.constant dense<0.000000e+00> : vector<8x128xf32>
    %49 = vector.multi_reduction <add>, %48, %cst_25 [0] : vector<2x8x128xf32> to vector<8x128xf32>
    %50 = arith.addf %47, %49 : vector<8x128xf32>
    %c2_26 = arith.constant 2 : index
    %c0_27 = arith.constant 0 : index
    %c0_28 = arith.constant 0 : index
    %51 = vector.load %arg4[%c2_26, %c0_27, %c0_28] : memref<4x8x128xf32, #tpu.memory_space<vmem>>, vector<1x8x128xf32>
    %52 = vector.shape_cast %51 : vector<1x8x128xf32> to vector<8x128xf32>
    %53 = vector.shape_cast %50 : vector<8x128xf32> to vector<1x8x128xf32>
    tpu.vector_store %arg4[%c2_26, %c0_27, %c0_28], %53 {strides = array<i32>} : memref<4x8x128xf32, #tpu.memory_space<vmem>>, vector<1x8x128xf32>,
    %c3 = arith.constant 3 : index
    %c0_29 = arith.constant 0 : index
    %c0_30 = arith.constant 0 : index
    %54 = vector.load %arg4[%c3, %c0_29, %c0_30] : memref<4x8x128xf32, #tpu.memory_space<vmem>>, vector<1x8x128xf32>
    %55 = vector.shape_cast %54 : vector<1x8x128xf32> to vector<8x128xf32>
    %56 = vector.shape_cast %4 : vector<16x128xf32> to vector<2x8x128xf32>
    %cst_31 = arith.constant dense<0.000000e+00> : vector<8x128xf32>
    %57 = vector.multi_reduction <add>, %56, %cst_31 [0] : vector<2x8x128xf32> to vector<8x128xf32>
    %58 = arith.addf %55, %57 : vector<8x128xf32>
    %c3_32 = arith.constant 3 : index
    %c0_33 = arith.constant 0 : index
    %c0_34 = arith.constant 0 : index
    %59 = vector.load %arg4[%c3_32, %c0_33, %c0_34] : memref<4x8x128xf32, #tpu.memory_space<vmem>>, vector<1x8x128xf32>
    %60 = vector.shape_cast %59 : vector<1x8x128xf32> to vector<8x128xf32>
    %61 = vector.shape_cast %58 : vector<8x128xf32> to vector<1x8x128xf32>
    tpu.vector_store %arg4[%c3_32, %c0_33, %c0_34], %61 {strides = array<i32>} : memref<4x8x128xf32, #tpu.memory_space<vmem>>, vector<1x8x128xf32>,
    return
  }
  func.func @transform_0(%arg0: i32, %arg1: i32) -> (i32, i32) {
    %c1_i32 = arith.constant 1 : i32
    %0 = arith.muli %arg0, %c1_i32 : i32
    %1 = arith.addi %0, %arg1 : i32
    %c0_i32 = arith.constant 0 : i32
    %c0_i32_0 = arith.constant 0 : i32
    return %1, %c0_i32 : i32, i32
  }
  func.func @transform_1(%arg0: i32, %arg1: i32) -> (i32, i32) {
    %c1_i32 = arith.constant 1 : i32
    %0 = arith.muli %arg0, %c1_i32 : i32
    %1 = arith.addi %0, %arg1 : i32
    %c0_i32 = arith.constant 0 : i32
    %c0_i32_0 = arith.constant 0 : i32
    return %1, %c0_i32 : i32, i32
  }
  func.func @transform_2(%arg0: i32, %arg1: i32) -> (i32, i32, i32) {
    %c0_i32 = arith.constant 0 : i32
    %c0_i32_0 = arith.constant 0 : i32
    %c0_i32_1 = arith.constant 0 : i32
    return %arg0, %c0_i32, %c0_i32_0 : i32, i32, i32
  }
}

module attributes {stable_mosaic.version = 11 : i64} {
  func.func @_sumsq_tile_kernel(%arg0: i32, %arg1: memref<2048x128xf32, #tpu.memory_space<vmem>>, %arg2: memref<8x128xf32, #tpu.memory_space<vmem>>) attributes {dimension_semantics = [#tpu.dimension_semantics<arbitrary>], iteration_bounds = array<i64: 1>, scalar_prefetch = 0 : i64, scratch_operands = 0 : i64, tpu.core_type = #tpu.core_type<tc>, window_params = [{transform_indices = @transform_0, window_bounds = array<i64: 2048, 128>}, {pipeline_mode = #tpu.pipeline_mode<synchronous>, transform_indices = @transform_1, window_bounds = array<i64: 8, 128>}]} {
    %c0_i32 = arith.constant 0 : i32
    %0 = arith.cmpi eq, %arg0, %c0_i32 : i32
    %1 = arith.extui %0 : i1 to i32
    %c0_i32_0 = arith.constant 0 : i32
    %2 = arith.cmpi ne, %1, %c0_i32_0 : i32
    scf.if %2 {
      %cst_6 = arith.constant 0.000000e+00 : f32
      %10 = vector.broadcast %cst_6 : f32 to vector<8x128xf32>
      %c0_7 = arith.constant 0 : index
      %c0_8 = arith.constant 0 : index
      %11 = vector.load %arg2[%c0_7, %c0_8] : memref<8x128xf32, #tpu.memory_space<vmem>>, vector<8x128xf32>
      tpu.vector_store %arg2[%c0_7, %c0_8], %10 {strides = array<i32>} : memref<8x128xf32, #tpu.memory_space<vmem>>, vector<8x128xf32>,
    } else {
    }
    %c0 = arith.constant 0 : index
    %c0_1 = arith.constant 0 : index
    %3 = vector.load %arg1[%c0, %c0_1] : memref<2048x128xf32, #tpu.memory_space<vmem>>, vector<2048x128xf32>
    %c0_2 = arith.constant 0 : index
    %c0_3 = arith.constant 0 : index
    %4 = vector.load %arg2[%c0_2, %c0_3] : memref<8x128xf32, #tpu.memory_space<vmem>>, vector<8x128xf32>
    %5 = arith.mulf %3, %3 : vector<2048x128xf32>
    %6 = vector.shape_cast %5 : vector<2048x128xf32> to vector<256x8x128xf32>
    %cst = arith.constant dense<0.000000e+00> : vector<8x128xf32>
    %7 = vector.multi_reduction <add>, %6, %cst [0] : vector<256x8x128xf32> to vector<8x128xf32>
    %8 = arith.addf %4, %7 : vector<8x128xf32>
    %c0_4 = arith.constant 0 : index
    %c0_5 = arith.constant 0 : index
    %9 = vector.load %arg2[%c0_4, %c0_5] : memref<8x128xf32, #tpu.memory_space<vmem>>, vector<8x128xf32>
    tpu.vector_store %arg2[%c0_4, %c0_5], %8 {strides = array<i32>} : memref<8x128xf32, #tpu.memory_space<vmem>>, vector<8x128xf32>,
    return
  }
  func.func @transform_0(%arg0: i32) -> (i32, i32) {
    %c0_i32 = arith.constant 0 : i32
    %c0_i32_0 = arith.constant 0 : i32
    return %arg0, %c0_i32 : i32, i32
  }
  func.func @transform_1(%arg0: i32) -> (i32, i32) {
    %c0_i32 = arith.constant 0 : i32
    %c0_i32_0 = arith.constant 0 : i32
    %c0_i32_1 = arith.constant 0 : i32
    return %c0_i32, %c0_i32_0 : i32, i32
  }
}

</mosaic_0001>

<bundles_post_ra>
// kernel: combined_loss_with_w.2
= control target key start
LH: loop header
LB: loop body
LE: loop exit
PB: predicated region body
PF: predicated region fallthrough
CT: control target
= control target key end

     0   :  { %s198_s0 = inlined_call_operand.vmem [shape: f32[16,128], index: 0, kind: input, shape index: {}]   ;;  %s199_s1 = inlined_call_operand.vmem [shape: f32[16,128], index: 1, kind: input, shape index: {}]   ;;  %s200_s2 = inlined_call_operand.vmem [shape: f32[4,8,128], index: 2, kind: output, shape index: {}]  }
   0x1   :  { %v63_v0 = vld [vmem:[%s198_s0] sm:$0xff]  ;;  %v64_v1 = vld [vmem:[%s198_s0 + $0x8] sm:$0xff] }
   0x2   :  { %v67_v2 = vand.u32 2147483647, %v63_v0  ;;  %v68_v3 = vand.u32 2147483647, %v64_v1  ;;  %v65_v4 = vld [vmem:[%s199_s1] sm:$0xff]  ;;  %v66_v5 = vld [vmem:[%s199_s1 + $0x8] sm:$0xff] }
   0x3   :  { %v121_v8 = vadd.f32 %v66_v5, %v65_v4  ;;  %v75_v15 = vmax.f32 %v63_v0, 0.0  ;;  %v77_v16 = vmul.f32 %v65_v4, %v63_v0  ;;  %v76_v17 = vmax.f32 %v64_v1, 0.0 }
   0x4   :  { %v69_v6 = vsub.f32 0.0, %v67_v2  ;;  %v70_v7 = vsub.f32 0.0, %v68_v3  ;;  %v78_v18 = vmul.f32 %v66_v5, %v64_v1  ;;  %vm97_vm0 = vcmp.ge.f32.partialorder %v63_v0, 0.0 }
   0x5   :  { %145 = vst [vmem:[%s200_s2 + $0x18] sm:$0xff] %v121_v8  ;;  %v79_v19 = vsub.f32 %v75_v15, %v77_v16  ;;  %vm98_vm1 = vcmp.ge.f32.partialorder %v64_v1, 0.0 }
   0x6   :  { %v71_v9 = vmul.f32 1.442695, %v69_v6  ;;  %v73_v10 = vmul.f32 1.442695, %v70_v7  ;;  %v80_v21 = vsub.f32 %v76_v17, %v78_v18 }
   0x8   :  { %147 = vpow2.f32 %v71_v9 }
   0x9   :  { %149 = vpow2.f32 %v73_v10 }
   0xe   :  { %v148_v11 = vpop.eup %147 }
   0xf   :  { %v150_v12 = vpop.eup %149  ;;  %v81_v13 = vadd.f32 1.0, %v148_v11  ;;  %v99_v34 = vsel %vm97_vm0, 1.0, %v148_v11 }
  0x10   :  { %v82_v14 = vadd.f32 1.0, %v150_v12  ;;  %v100_v36 = vsel %vm98_vm1, 1.0, %v150_v12 }
  0x11   :  { %151 = vlog2.f32 %v81_v13 }
  0x12   :  { %153 = vlog2.f32 %v82_v14 }
  0x13   :  { %155 = vrcp.f32 %v81_v13 }
  0x14   :  { %157 = vrcp.f32 %v82_v14 }
  0x17   :  { %v152_v20 = vpop.eup %151 }
  0x18   :  { %v154_v22 = vpop.eup %153  ;;  %v84_v23 = vmul.f32 0.6931472, %v152_v20 }
  0x19   :  { %v156_v24 = vpop.eup %155  ;;  %v86_v25 = vmul.f32 0.6931472, %v154_v22 }
  0x1a   :  { %v158_v26 = vpop.eup %157  ;;  %v87_v27 = vadd.f32 %v84_v23, %v79_v19  ;;  %v91_v28 = vmul.f32 %v156_v24, %v81_v13 }
  0x1b   :  { %v88_v29 = vadd.f32 %v86_v25, %v80_v21  ;;  %v92_v30 = vmul.f32 %v158_v26, %v82_v14 }
  0x1c   :  { %v93_v31 = vsub.f32 2.0, %v91_v28 }
  0x1d   :  { %v104_v32 = vadd.f32 %v88_v29, %v87_v27  ;;  %v94_v33 = vsub.f32 2.0, %v92_v30 }
  0x1e   :  { %v95_v35 = vmul.f32 %v156_v24, %v93_v31 }
  0x1f   :  { %v96_v37 = vmul.f32 %v158_v26, %v94_v33  ;;  %106 = vst [vmem:[%s200_s2] sm:$0xff] %v104_v32 }
  0x20   :  { %v101_v38 = vmul.f32 %v99_v34, %v95_v35 }
  0x21   :  { %v102_v39 = vmul.f32 %v100_v36, %v96_v37 }
  0x22   :  { %v109_v40 = vmul.f32 %v101_v38, %v65_v4 }
  0x23   :  { %v110_v41 = vmul.f32 %v102_v39, %v66_v5  ;;  %v116_v42 = vadd.f32 %v102_v39, %v101_v38 }
  0x25   :  { %v111_v43 = vadd.f32 %v110_v41, %v109_v40  ;;  %143 = vst [vmem:[%s200_s2 + $0x10] sm:$0xff] %v116_v42 }
  0x27   :  { %141 = vst [vmem:[%s200_s2 + $0x8] sm:$0xff] %v111_v43 }

// kernel: combined_loss_with_w.3
= control target key start
LH: loop header
LB: loop body
LE: loop exit
PB: predicated region body
PF: predicated region fallthrough
CT: control target
= control target key end

     0   :  { %s1569_s0 = inlined_call_operand.vmem [shape: f32[2048,128], index: 0, kind: input, shape index: {}]   ;;  %s1570_s1 = inlined_call_operand.vmem [shape: f32[8,128], index: 1, kind: output, shape index: {}]  }
   0x1   :  { %v13_v0 = vld [vmem:[%s1569_s0] sm:$0xff]  ;;  %v14_v1 = vld [vmem:[%s1569_s0 + $0x8] sm:$0xff]  ;;  %v15_v4 = vld [vmem:[%s1569_s0 + $0x10] sm:$0xff] }
   0x2   :  { %v270_v2 = vmul.f32 %v13_v0, %v13_v0  ;;  %v271_v3 = vmul.f32 %v14_v1, %v14_v1  ;;  %v272_v5 = vmul.f32 %v15_v4, %v15_v4  ;;  %v16_v7 = vld [vmem:[%s1569_s0 + $0x18] sm:$0xff]  ;;  %v17_v10 = vld [vmem:[%s1569_s0 + $0x20] sm:$0xff]  ;;  %v18_v13 = vld [vmem:[%s1569_s0 + $0x28] sm:$0xff] }
   0x3   :  { %v273_v8 = vmul.f32 %v16_v7, %v16_v7  ;;  %v274_v11 = vmul.f32 %v17_v10, %v17_v10  ;;  %v275_v14 = vmul.f32 %v18_v13, %v18_v13  ;;  %v19_v16 = vld [vmem:[%s1569_s0 + $0x30] sm:$0xff]  ;;  %v20_v19 = vld [vmem:[%s1569_s0 + $0x38] sm:$0xff]  ;;  %v21_v22 = vld [vmem:[%s1569_s0 + $0x40] sm:$0xff] }
   0x4   :  { %v526_v6 = vadd.f32 %v271_v3, %v270_v2  ;;  %v276_v17 = vmul.f32 %v19_v16, %v19_v16  ;;  %v277_v20 = vmul.f32 %v20_v19, %v20_v19  ;;  %v278_v23 = vmul.f32 %v21_v22, %v21_v22  ;;  %v22_v25 = vld [vmem:[%s1569_s0 + $0x48] sm:$0xff]  ;;  %v23_v28 = vld [vmem:[%s1569_s0 + $0x50] sm:$0xff]  ;;  %v24_v31 = vld [vmem:[%s1569_s0 + $0x58] sm:$0xff] }
   0x5   :  { %v279_v26 = vmul.f32 %v22_v25, %v22_v25  ;;  %v280_v29 = vmul.f32 %v23_v28, %v23_v28  ;;  %v281_v32 = vmul.f32 %v24_v31, %v24_v31  ;;  %v25_v34 = vld [vmem:[%s1569_s0 + $0x60] sm:$0xff]  ;;  %v26_v37 = vld [vmem:[%s1569_s0 + $0x68] sm:$0xff]  ;;  %v27_v40 = vld [vmem:[%s1569_s0 + $0x70] sm:$0xff] }
   0x6   :  { %v527_v9 = vadd.f32 %v526_v6, %v272_v5  ;;  %v282_v35 = vmul.f32 %v25_v34, %v25_v34  ;;  %v283_v38 = vmul.f32 %v26_v37, %v26_v37  ;;  %v284_v41 = vmul.f32 %v27_v40, %v27_v40  ;;  %v28_v43 = vld [vmem:[%s1569_s0 + $0x78] sm:$0xff]  ;;  %v29_v46 = vld [vmem:[%s1569_s0 + $0x80] sm:$0xff]  ;;  %v30_v49 = vld [vmem:[%s1569_s0 + $0x88] sm:$0xff] }
   0x7   :  { %v285_v44 = vmul.f32 %v28_v43, %v28_v43  ;;  %v286_v47 = vmul.f32 %v29_v46, %v29_v46  ;;  %v287_v50 = vmul.f32 %v30_v49, %v30_v49  ;;  %v31_v52 = vld [vmem:[%s1569_s0 + $0x90] sm:$0xff]  ;;  %v32_v55 = vld [vmem:[%s1569_s0 + $0x98] sm:$0xff]  ;;  %v33_v58 = vld [vmem:[%s1569_s0 + $0xa0] sm:$0xff] }
   0x8   :  { %v528_v12 = vadd.f32 %v527_v9, %v273_v8  ;;  %v288_v53 = vmul.f32 %v31_v52, %v31_v52  ;;  %v289_v56 = vmul.f32 %v32_v55, %v32_v55  ;;  %v290_v59 = vmul.f32 %v33_v58, %v33_v58  ;;  %v34_v61 = vld [vmem:[%s1569_s0 + $0xa8] sm:$0xff]  ;;  %v35_v0 = vld [vmem:[%s1569_s0 + $0xb0] sm:$0xff]  ;;  %v36_v3 = vld [vmem:[%s1569_s0 + $0xb8] sm:$0xff] }
   0x9   :  { %v291_v62 = vmul.f32 %v34_v61, %v34_v61  ;;  %v292_v1 = vmul.f32 %v35_v0, %v35_v0  ;;  %v293_v4 = vmul.f32 %v36_v3, %v36_v3  ;;  %v37_v6 = vld [vmem:[%s1569_s0 + $0xc0] sm:$0xff]  ;;  %v38_v9 = vld [vmem:[%s1569_s0 + $0xc8] sm:$0xff]  ;;  %v40_v13 = vld [vmem:[%s1569_s0 + $0xd8] sm:$0xff] }
   0xa   :  { %v529_v15 = vadd.f32 %v528_v12, %v274_v11  ;;  %v294_v7 = vmul.f32 %v37_v6, %v37_v6  ;;  %v295_v10 = vmul.f32 %v38_v9, %v38_v9  ;;  %v39_v12 = vld [vmem:[%s1569_s0 + $0xd0] sm:$0xff]  ;;  %v41_v16 = vld [vmem:[%s1569_s0 + $0xe0] sm:$0xff] }
   0xb   :  { %v298_v19 = vmul.f32 %v41_v16, %v41_v16 }
   0xc   :  { %v530_v18 = vadd.f32 %v529_v15, %v275_v14  ;;  %v296_v14 = vmul.f32 %v39_v12, %v39_v12 }
   0xe   :  { %v531_v21 = vadd.f32 %v530_v18, %v276_v17  ;;  %v297_v17 = vmul.f32 %v40_v13, %v40_v13  ;;  %v42_v18 = vld [vmem:[%s1569_s0 + $0xe8] sm:$0xff] }
   0xf   :  { %v299_v22 = vmul.f32 %v42_v18, %v42_v18 }
  0x10   :  { %v532_v24 = vadd.f32 %v531_v21, %v277_v20  ;;  %v43_v21 = vld [vmem:[%s1569_s0 + $0xf0] sm:$0xff] }
  0x11   :  { %v300_v25 = vmul.f32 %v43_v21, %v43_v21 }
  0x12   :  { %v533_v27 = vadd.f32 %v532_v24, %v278_v23  ;;  %v44_v24 = vld [vmem:[%s1569_s0 + $0xf8] sm:$0xff] }
  0x13   :  { %v301_v28 = vmul.f32 %v44_v24, %v44_v24 }
  0x14   :  { %v534_v30 = vadd.f32 %v533_v27, %v279_v26  ;;  %v45_v27 = vld [vmem:[%s1569_s0 + $0x100] sm:$0xff] }
  0x15   :  { %v302_v31 = vmul.f32 %v45_v27, %v45_v27 }
  0x16   :  { %v535_v33 = vadd.f32 %v534_v30, %v280_v29  ;;  %v46_v30 = vld [vmem:[%s1569_s0 + $0x108] sm:$0xff] }
  0x17   :  { %v303_v34 = vmul.f32 %v46_v30, %v46_v30 }
  0x18   :  { %v536_v36 = vadd.f32 %v535_v33, %v281_v32  ;;  %v47_v33 = vld [vmem:[%s1569_s0 + $0x110] sm:$0xff] }
  0x19   :  { %v304_v37 = vmul.f32 %v47_v33, %v47_v33 }
  0x1a   :  { %v537_v39 = vadd.f32 %v536_v36, %v282_v35  ;;  %v48_v36 = vld [vmem:[%s1569_s0 + $0x118] sm:$0xff] }
  0x1b   :  { %v305_v40 = vmul.f32 %v48_v36, %v48_v36 }
  0x1c   :  { %v538_v42 = vadd.f32 %v537_v39, %v283_v38  ;;  %v49_v39 = vld [vmem:[%s1569_s0 + $0x120] sm:$0xff] }
  0x1d   :  { %v306_v43 = vmul.f32 %v49_v39, %v49_v39 }
  0x1e   :  { %v539_v45 = vadd.f32 %v538_v42, %v284_v41  ;;  %v50_v42 = vld [vmem:[%s1569_s0 + $0x128] sm:$0xff] }
  0x1f   :  { %v307_v46 = vmul.f32 %v50_v42, %v50_v42 }
  0x20   :  { %v540_v48 = vadd.f32 %v539_v45, %v285_v44  ;;  %v51_v45 = vld [vmem:[%s1569_s0 + $0x130] sm:$0xff] }
  0x21   :  { %v308_v49 = vmul.f32 %v51_v45, %v51_v45 }
  0x22   :  { %v541_v51 = vadd.f32 %v540_v48, %v286_v47  ;;  %v52_v48 = vld [vmem:[%s1569_s0 + $0x138] sm:$0xff] }
  0x23   :  { %v309_v52 = vmul.f32 %v52_v48, %v52_v48 }
  0x24   :  { %v542_v54 = vadd.f32 %v541_v51, %v287_v50  ;;  %v53_v51 = vld [vmem:[%s1569_s0 + $0x140] sm:$0xff] }
  0x25   :  { %v310_v55 = vmul.f32 %v53_v51, %v53_v51 }
  0x26   :  { %v543_v57 = vadd.f32 %v542_v54, %v288_v53  ;;  %v54_v54 = vld [vmem:[%s1569_s0 + $0x148] sm:$0xff] }
  0x27   :  { %v311_v58 = vmul.f32 %v54_v54, %v54_v54 }
  0x28   :  { %v544_v60 = vadd.f32 %v543_v57, %v289_v56  ;;  %v55_v57 = vld [vmem:[%s1569_s0 + $0x150] sm:$0xff] }
  0x29   :  { %v312_v61 = vmul.f32 %v55_v57, %v55_v57 }
  0x2a   :  { %v545_v63 = vadd.f32 %v544_v60, %v290_v59  ;;  %v56_v60 = vld [vmem:[%s1569_s0 + $0x158] sm:$0xff] }
  0x2b   :  { %v313_v0 = vmul.f32 %v56_v60, %v56_v60 }
  0x2c   :  { %v546_v2 = vadd.f32 %v545_v63, %v291_v62  ;;  %v57_v63 = vld [vmem:[%s1569_s0 + $0x160] sm:$0xff] }
  0x2d   :  { %v314_v3 = vmul.f32 %v57_v63, %v57_v63 }
  0x2e   :  { %v547_v5 = vadd.f32 %v546_v2, %v292_v1  ;;  %v58_v2 = vld [vmem:[%s1569_s0 + $0x168] sm:$0xff] }
  0x2f   :  { %v315_v6 = vmul.f32 %v58_v2, %v58_v2 }
  0x30   :  { %v548_v8 = vadd.f32 %v547_v5, %v293_v4  ;;  %v59_v5 = vld [vmem:[%s1569_s0 + $0x170] sm:$0xff] }
  0x31   :  { %v316_v9 = vmul.f32 %v59_v5, %v59_v5 }
  0x32   :  { %v549_v11 = vadd.f32 %v548_v8, %v294_v7  ;;  %v60_v8 = vld [vmem:[%s1569_s0 + $0x178] sm:$0xff] }
  0x33   :  { %v317_v12 = vmul.f32 %v60_v8, %v60_v8 }
  0x34   :  { %v550_v15 = vadd.f32 %v549_v11, %v295_v10  ;;  %v61_v11 = vld [vmem:[%s1569_s0 + $0x180] sm:$0xff] }
  0x36   :  { %v551_v20 = vadd.f32 %v550_v15, %v296_v14  ;;  %v62_v14 = vld [vmem:[%s1569_s0 + $0x188] sm:$0xff]  ;;  %v318_v15 = vmul.f32 %v61_v11, %v61_v11 }
  0x37   :  { %v319_v18 = vmul.f32 %v62_v14, %v62_v14 }
  0x38   :  { %v552_v23 = vadd.f32 %v551_v20, %v297_v17  ;;  %v63_v17 = vld [vmem:[%s1569_s0 + $0x190] sm:$0xff]  ;;  %v64_v20 = vld [vmem:[%s1569_s0 + $0x198] sm:$0xff] }
  0x39   :  { %v320_v21 = vmul.f32 %v63_v17, %v63_v17  ;;  %v321_v24 = vmul.f32 %v64_v20, %v64_v20 }
  0x3a   :  { %v553_v26 = vadd.f32 %v552_v23, %v298_v19  ;;  %v65_v23 = vld [vmem:[%s1569_s0 + $0x1a0] sm:$0xff] }
  0x3b   :  { %v322_v27 = vmul.f32 %v65_v23, %v65_v23 }
  0x3c   :  { %v554_v29 = vadd.f32 %v553_v26, %v299_v22  ;;  %v66_v26 = vld [vmem:[%s1569_s0 + $0x1a8] sm:$0xff] }
  0x3d   :  { %v323_v30 = vmul.f32 %v66_v26, %v66_v26 }
  0x3e   :  { %v555_v32 = vadd.f32 %v554_v29, %v300_v25  ;;  %v67_v29 = vld [vmem:[%s1569_s0 + $0x1b0] sm:$0xff] }
  0x3f   :  { %v324_v33 = vmul.f32 %v67_v29, %v67_v29 }
  0x40   :  { %v556_v35 = vadd.f32 %v555_v32, %v301_v28  ;;  %v68_v32 = vld [vmem:[%s1569_s0 + $0x1b8] sm:$0xff] }
  0x41   :  { %v325_v36 = vmul.f32 %v68_v32, %v68_v32 }
  0x42   :  { %v557_v38 = vadd.f32 %v556_v35, %v302_v31  ;;  %v69_v35 = vld [vmem:[%s1569_s0 + $0x1c0] sm:$0xff] }
  0x43   :  { %v326_v39 = vmul.f32 %v69_v35, %v69_v35 }
  0x44   :  { %v558_v41 = vadd.f32 %v557_v38, %v303_v34  ;;  %v70_v38 = vld [vmem:[%s1569_s0 + $0x1c8] sm:$0xff] }
  0x45   :  { %v327_v42 = vmul.f32 %v70_v38, %v70_v38 }
  0x46   :  { %v559_v44 = vadd.f32 %v558_v41, %v304_v37  ;;  %v71_v41 = vld [vmem:[%s1569_s0 + $0x1d0] sm:$0xff] }
  0x47   :  { %v328_v45 = vmul.f32 %v71_v41, %v71_v41 }
  0x48   :  { %v560_v47 = vadd.f32 %v559_v44, %v305_v40  ;;  %v72_v44 = vld [vmem:[%s1569_s0 + $0x1d8] sm:$0xff] }
  0x49   :  { %v329_v48 = vmul.f32 %v72_v44, %v72_v44 }
  0x4a   :  { %v561_v50 = vadd.f32 %v560_v47, %v306_v43  ;;  %v73_v47 = vld [vmem:[%s1569_s0 + $0x1e0] sm:$0xff] }
  0x4b   :  { %v330_v51 = vmul.f32 %v73_v47, %v73_v47 }
  0x4c   :  { %v562_v53 = vadd.f32 %v561_v50, %v307_v46  ;;  %v74_v50 = vld [vmem:[%s1569_s0 + $0x1e8] sm:$0xff] }
  0x4d   :  { %v331_v54 = vmul.f32 %v74_v50, %v74_v50 }
  0x4e   :  { %v563_v56 = vadd.f32 %v562_v53, %v308_v49  ;;  %v75_v53 = vld [vmem:[%s1569_s0 + $0x1f0] sm:$0xff] }
  0x4f   :  { %v332_v57 = vmul.f32 %v75_v53, %v75_v53 }
  0x50   :  { %v564_v59 = vadd.f32 %v563_v56, %v309_v52  ;;  %v76_v56 = vld [vmem:[%s1569_s0 + $0x1f8] sm:$0xff] }
  0x51   :  { %v333_v60 = vmul.f32 %v76_v56, %v76_v56 }
  0x52   :  { %v565_v62 = vadd.f32 %v564_v59, %v310_v55  ;;  %v77_v59 = vld [vmem:[%s1569_s0 + $0x200] sm:$0xff] }
  0x53   :  { %v334_v63 = vmul.f32 %v77_v59, %v77_v59 }
  0x54   :  { %v566_v1 = vadd.f32 %v565_v62, %v311_v58  ;;  %v78_v62 = vld [vmem:[%s1569_s0 + $0x208] sm:$0xff] }
  0x55   :  { %v335_v2 = vmul.f32 %v78_v62, %v78_v62 }
  0x56   :  { %v567_v4 = vadd.f32 %v566_v1, %v312_v61  ;;  %v79_v1 = vld [vmem:[%s1569_s0 + $0x210] sm:$0xff] }
  0x57   :  { %v336_v5 = vmul.f32 %v79_v1, %v79_v1 }
  0x58   :  { %v568_v7 = vadd.f32 %v567_v4, %v313_v0  ;;  %v80_v4 = vld [vmem:[%s1569_s0 + $0x218] sm:$0xff] }
  0x59   :  { %v337_v8 = vmul.f32 %v80_v4, %v80_v4 }
  0x5a   :  { %v569_v10 = vadd.f32 %v568_v7, %v314_v3  ;;  %v81_v7 = vld [vmem:[%s1569_s0 + $0x220] sm:$0xff] }
  0x5b   :  { %v338_v11 = vmul.f32 %v81_v7, %v81_v7 }
  0x5c   :  { %v570_v13 = vadd.f32 %v569_v10, %v315_v6  ;;  %v82_v10 = vld [vmem:[%s1569_s0 + $0x228] sm:$0xff] }
  0x5d   :  { %v339_v14 = vmul.f32 %v82_v10, %v82_v10 }
  0x5e   :  { %v571_v16 = vadd.f32 %v570_v13, %v316_v9  ;;  %v83_v13 = vld [vmem:[%s1569_s0 + $0x230] sm:$0xff] }
  0x5f   :  { %v340_v17 = vmul.f32 %v83_v13, %v83_v13 }
  0x60   :  { %v572_v19 = vadd.f32 %v571_v16, %v317_v12  ;;  %v84_v16 = vld [vmem:[%s1569_s0 + $0x238] sm:$0xff] }
  0x61   :  { %v341_v20 = vmul.f32 %v84_v16, %v84_v16 }
  0x62   :  { %v573_v22 = vadd.f32 %v572_v19, %v318_v15  ;;  %v85_v19 = vld [vmem:[%s1569_s0 + $0x240] sm:$0xff] }
  0x63   :  { %v342_v23 = vmul.f32 %v85_v19, %v85_v19 }
  0x64   :  { %v574_v25 = vadd.f32 %v573_v22, %v319_v18  ;;  %v86_v22 = vld [vmem:[%s1569_s0 + $0x248] sm:$0xff] }
  0x65   :  { %v343_v26 = vmul.f32 %v86_v22, %v86_v22 }
  0x66   :  { %v575_v28 = vadd.f32 %v574_v25, %v320_v21  ;;  %v87_v25 = vld [vmem:[%s1569_s0 + $0x250] sm:$0xff] }
  0x67   :  { %v344_v29 = vmul.f32 %v87_v25, %v87_v25 }
  0x68   :  { %v576_v31 = vadd.f32 %v575_v28, %v321_v24  ;;  %v88_v28 = vld [vmem:[%s1569_s0 + $0x258] sm:$0xff] }
  0x69   :  { %v345_v32 = vmul.f32 %v88_v28, %v88_v28 }
  0x6a   :  { %v577_v34 = vadd.f32 %v576_v31, %v322_v27  ;;  %v89_v31 = vld [vmem:[%s1569_s0 + $0x260] sm:$0xff] }
  0x6b   :  { %v346_v35 = vmul.f32 %v89_v31, %v89_v31 }
  0x6c   :  { %v578_v37 = vadd.f32 %v577_v34, %v323_v30  ;;  %v90_v34 = vld [vmem:[%s1569_s0 + $0x268] sm:$0xff] }
  0x6d   :  { %v347_v38 = vmul.f32 %v90_v34, %v90_v34 }
  0x6e   :  { %v579_v40 = vadd.f32 %v578_v37, %v324_v33  ;;  %v91_v37 = vld [vmem:[%s1569_s0 + $0x270] sm:$0xff] }
  0x6f   :  { %v348_v41 = vmul.f32 %v91_v37, %v91_v37 }
  0x70   :  { %v580_v43 = vadd.f32 %v579_v40, %v325_v36  ;;  %v92_v40 = vld [vmem:[%s1569_s0 + $0x278] sm:$0xff] }
  0x71   :  { %v349_v44 = vmul.f32 %v92_v40, %v92_v40 }
  0x72   :  { %v581_v46 = vadd.f32 %v580_v43, %v326_v39  ;;  %v93_v43 = vld [vmem:[%s1569_s0 + $0x280] sm:$0xff] }
  0x73   :  { %v350_v47 = vmul.f32 %v93_v43, %v93_v43 }
  0x74   :  { %v582_v49 = vadd.f32 %v581_v46, %v327_v42  ;;  %v94_v46 = vld [vmem:[%s1569_s0 + $0x288] sm:$0xff] }
  0x75   :  { %v351_v50 = vmul.f32 %v94_v46, %v94_v46 }
  0x76   :  { %v583_v52 = vadd.f32 %v582_v49, %v328_v45  ;;  %v95_v49 = vld [vmem:[%s1569_s0 + $0x290] sm:$0xff] }
  0x77   :  { %v352_v53 = vmul.f32 %v95_v49, %v95_v49 }
  0x78   :  { %v584_v55 = vadd.f32 %v583_v52, %v329_v48  ;;  %v96_v52 = vld [vmem:[%s1569_s0 + $0x298] sm:$0xff] }
  0x79   :  { %v353_v56 = vmul.f32 %v96_v52, %v96_v52 }
  0x7a   :  { %v585_v58 = vadd.f32 %v584_v55, %v330_v51  ;;  %v97_v55 = vld [vmem:[%s1569_s0 + $0x2a0] sm:$0xff] }
  0x7b   :  { %v354_v59 = vmul.f32 %v97_v55, %v97_v55 }
  0x7c   :  { %v586_v61 = vadd.f32 %v585_v58, %v331_v54  ;;  %v98_v58 = vld [vmem:[%s1569_s0 + $0x2a8] sm:$0xff] }
  0x7d   :  { %v355_v62 = vmul.f32 %v98_v58, %v98_v58 }
  0x7e   :  { %v587_v0 = vadd.f32 %v586_v61, %v332_v57  ;;  %v99_v61 = vld [vmem:[%s1569_s0 + $0x2b0] sm:$0xff] }
  0x7f   :  { %v356_v1 = vmul.f32 %v99_v61, %v99_v61 }
  0x80   :  { %v588_v3 = vadd.f32 %v587_v0, %v333_v60  ;;  %v100_v0 = vld [vmem:[%s1569_s0 + $0x2b8] sm:$0xff] }
  0x81   :  { %v357_v4 = vmul.f32 %v100_v0, %v100_v0 }
  0x82   :  { %v589_v6 = vadd.f32 %v588_v3, %v334_v63  ;;  %v101_v3 = vld [vmem:[%s1569_s0 + $0x2c0] sm:$0xff] }
  0x83   :  { %v358_v7 = vmul.f32 %v101_v3, %v101_v3 }
  0x84   :  { %v590_v9 = vadd.f32 %v589_v6, %v335_v2  ;;  %v102_v6 = vld [vmem:[%s1569_s0 + $0x2c8] sm:$0xff] }
  0x85   :  { %v359_v10 = vmul.f32 %v102_v6, %v102_v6 }
  0x86   :  { %v591_v12 = vadd.f32 %v590_v9, %v336_v5  ;;  %v103_v9 = vld [vmem:[%s1569_s0 + $0x2d0] sm:$0xff] }
  0x87   :  { %v360_v13 = vmul.f32 %v103_v9, %v103_v9 }
  0x88   :  { %v592_v15 = vadd.f32 %v591_v12, %v337_v8  ;;  %v104_v12 = vld [vmem:[%s1569_s0 + $0x2d8] sm:$0xff] }
  0x89   :  { %v361_v16 = vmul.f32 %v104_v12, %v104_v12 }
  0x8a   :  { %v593_v18 = vadd.f32 %v592_v15, %v338_v11  ;;  %v105_v15 = vld [vmem:[%s1569_s0 + $0x2e0] sm:$0xff] }
  0x8b   :  { %v362_v19 = vmul.f32 %v105_v15, %v105_v15 }
  0x8c   :  { %v594_v21 = vadd.f32 %v593_v18, %v339_v14  ;;  %v106_v18 = vld [vmem:[%s1569_s0 + $0x2e8] sm:$0xff] }
  0x8d   :  { %v363_v22 = vmul.f32 %v106_v18, %v106_v18 }
  0x8e   :  { %v595_v24 = vadd.f32 %v594_v21, %v340_v17  ;;  %v107_v21 = vld [vmem:[%s1569_s0 + $0x2f0] sm:$0xff] }
  0x8f   :  { %v364_v25 = vmul.f32 %v107_v21, %v107_v21 }
  0x90   :  { %v596_v27 = vadd.f32 %v595_v24, %v341_v20  ;;  %v108_v24 = vld [vmem:[%s1569_s0 + $0x2f8] sm:$0xff] }
  0x91   :  { %v365_v28 = vmul.f32 %v108_v24, %v108_v24 }
  0x92   :  { %v597_v30 = vadd.f32 %v596_v27, %v342_v23  ;;  %v109_v27 = vld [vmem:[%s1569_s0 + $0x300] sm:$0xff] }
  0x93   :  { %v366_v31 = vmul.f32 %v109_v27, %v109_v27 }
  0x94   :  { %v598_v33 = vadd.f32 %v597_v30, %v343_v26  ;;  %v110_v30 = vld [vmem:[%s1569_s0 + $0x308] sm:$0xff] }
  0x95   :  { %v367_v34 = vmul.f32 %v110_v30, %v110_v30 }
  0x96   :  { %v599_v36 = vadd.f32 %v598_v33, %v344_v29  ;;  %v111_v33 = vld [vmem:[%s1569_s0 + $0x310] sm:$0xff] }
  0x97   :  { %v368_v37 = vmul.f32 %v111_v33, %v111_v33 }
  0x98   :  { %v600_v39 = vadd.f32 %v599_v36, %v345_v32  ;;  %v112_v36 = vld [vmem:[%s1569_s0 + $0x318] sm:$0xff] }
  0x99   :  { %v369_v40 = vmul.f32 %v112_v36, %v112_v36 }
  0x9a   :  { %v601_v42 = vadd.f32 %v600_v39, %v346_v35  ;;  %v113_v39 = vld [vmem:[%s1569_s0 + $0x320] sm:$0xff] }
  0x9b   :  { %v370_v43 = vmul.f32 %v113_v39, %v113_v39 }
  0x9c   :  { %v602_v45 = vadd.f32 %v601_v42, %v347_v38  ;;  %v114_v42 = vld [vmem:[%s1569_s0 + $0x328] sm:$0xff] }
  0x9d   :  { %v371_v46 = vmul.f32 %v114_v42, %v114_v42 }
  0x9e   :  { %v603_v48 = vadd.f32 %v602_v45, %v348_v41  ;;  %v115_v45 = vld [vmem:[%s1569_s0 + $0x330] sm:$0xff] }
  0x9f   :  { %v372_v49 = vmul.f32 %v115_v45, %v115_v45 }
  0xa0   :  { %v604_v51 = vadd.f32 %v603_v48, %v349_v44  ;;  %v116_v48 = vld [vmem:[%s1569_s0 + $0x338] sm:$0xff] }
  0xa1   :  { %v373_v52 = vmul.f32 %v116_v48, %v116_v48 }
  0xa2   :  { %v605_v54 = vadd.f32 %v604_v51, %v350_v47  ;;  %v117_v51 = vld [vmem:[%s1569_s0 + $0x340] sm:$0xff] }
  0xa3   :  { %v374_v55 = vmul.f32 %v117_v51, %v117_v51 }
  0xa4   :  { %v606_v57 = vadd.f32 %v605_v54, %v351_v50  ;;  %v118_v54 = vld [vmem:[%s1569_s0 + $0x348] sm:$0xff] }
  0xa5   :  { %v375_v58 = vmul.f32 %v118_v54, %v118_v54 }
  0xa6   :  { %v607_v60 = vadd.f32 %v606_v57, %v352_v53  ;;  %v119_v57 = vld [vmem:[%s1569_s0 + $0x350] sm:$0xff] }
  0xa7   :  { %v376_v61 = vmul.f32 %v119_v57, %v119_v57 }
  0xa8   :  { %v608_v63 = vadd.f32 %v607_v60, %v353_v56  ;;  %v120_v60 = vld [vmem:[%s1569_s0 + $0x358] sm:$0xff] }
  0xa9   :  { %v377_v0 = vmul.f32 %v120_v60, %v120_v60 }
  0xaa   :  { %v609_v2 = vadd.f32 %v608_v63, %v354_v59  ;;  %v121_v63 = vld [vmem:[%s1569_s0 + $0x360] sm:$0xff] }
  0xab   :  { %v378_v3 = vmul.f32 %v121_v63, %v121_v63 }
  0xac   :  { %v610_v5 = vadd.f32 %v609_v2, %v355_v62  ;;  %v122_v2 = vld [vmem:[%s1569_s0 + $0x368] sm:$0xff] }
  0xad   :  { %v379_v6 = vmul.f32 %v122_v2, %v122_v2 }
  0xae   :  { %v611_v8 = vadd.f32 %v610_v5, %v356_v1  ;;  %v123_v5 = vld [vmem:[%s1569_s0 + $0x370] sm:$0xff] }
  0xaf   :  { %v380_v9 = vmul.f32 %v123_v5, %v123_v5 }
  0xb0   :  { %v612_v11 = vadd.f32 %v611_v8, %v357_v4  ;;  %v124_v8 = vld [vmem:[%s1569_s0 + $0x378] sm:$0xff] }
  0xb1   :  { %v381_v12 = vmul.f32 %v124_v8, %v124_v8 }
  0xb2   :  { %v613_v14 = vadd.f32 %v612_v11, %v358_v7  ;;  %v125_v11 = vld [vmem:[%s1569_s0 + $0x380] sm:$0xff] }
  0xb3   :  { %v382_v15 = vmul.f32 %v125_v11, %v125_v11 }
  0xb4   :  { %v614_v17 = vadd.f32 %v613_v14, %v359_v10  ;;  %v126_v14 = vld [vmem:[%s1569_s0 + $0x388] sm:$0xff] }
  0xb5   :  { %v383_v18 = vmul.f32 %v126_v14, %v126_v14 }
  0xb6   :  { %v615_v20 = vadd.f32 %v614_v17, %v360_v13  ;;  %v127_v17 = vld [vmem:[%s1569_s0 + $0x390] sm:$0xff] }
  0xb7   :  { %v384_v21 = vmul.f32 %v127_v17, %v127_v17 }
  0xb8   :  { %v616_v23 = vadd.f32 %v615_v20, %v361_v16  ;;  %v128_v20 = vld [vmem:[%s1569_s0 + $0x398] sm:$0xff] }
  0xb9   :  { %v385_v24 = vmul.f32 %v128_v20, %v128_v20 }
  0xba   :  { %v617_v26 = vadd.f32 %v616_v23, %v362_v19  ;;  %v129_v23 = vld [vmem:[%s1569_s0 + $0x3a0] sm:$0xff] }
  0xbb   :  { %v386_v27 = vmul.f32 %v129_v23, %v129_v23 }
  0xbc   :  { %v618_v29 = vadd.f32 %v617_v26, %v363_v22  ;;  %v130_v26 = vld [vmem:[%s1569_s0 + $0x3a8] sm:$0xff] }
  0xbd   :  { %v387_v30 = vmul.f32 %v130_v26, %v130_v26 }
  0xbe   :  { %v619_v32 = vadd.f32 %v618_v29, %v364_v25  ;;  %v131_v29 = vld [vmem:[%s1569_s0 + $0x3b0] sm:$0xff] }
  0xbf   :  { %v388_v33 = vmul.f32 %v131_v29, %v131_v29 }
  0xc0   :  { %v620_v35 = vadd.f32 %v619_v32, %v365_v28  ;;  %v132_v32 = vld [vmem:[%s1569_s0 + $0x3b8] sm:$0xff] }
  0xc1   :  { %v389_v36 = vmul.f32 %v132_v32, %v132_v32 }
  0xc2   :  { %v621_v38 = vadd.f32 %v620_v35, %v366_v31  ;;  %v133_v35 = vld [vmem:[%s1569_s0 + $0x3c0] sm:$0xff] }
  0xc3   :  { %v390_v39 = vmul.f32 %v133_v35, %v133_v35 }
  0xc4   :  { %v622_v41 = vadd.f32 %v621_v38, %v367_v34  ;;  %v134_v38 = vld [vmem:[%s1569_s0 + $0x3c8] sm:$0xff] }
  0xc5   :  { %v391_v42 = vmul.f32 %v134_v38, %v134_v38 }
  0xc6   :  { %v623_v44 = vadd.f32 %v622_v41, %v368_v37  ;;  %v135_v41 = vld [vmem:[%s1569_s0 + $0x3d0] sm:$0xff] }
  0xc7   :  { %v392_v45 = vmul.f32 %v135_v41, %v135_v41 }
  0xc8   :  { %v624_v47 = vadd.f32 %v623_v44, %v369_v40  ;;  %v136_v44 = vld [vmem:[%s1569_s0 + $0x3d8] sm:$0xff] }
  0xc9   :  { %v393_v48 = vmul.f32 %v136_v44, %v136_v44 }
  0xca   :  { %v625_v50 = vadd.f32 %v624_v47, %v370_v43  ;;  %v137_v47 = vld [vmem:[%s1569_s0 + $0x3e0] sm:$0xff] }
  0xcb   :  { %v394_v51 = vmul.f32 %v137_v47, %v137_v47 }
  0xcc   :  { %v626_v53 = vadd.f32 %v625_v50, %v371_v46  ;;  %v138_v50 = vld [vmem:[%s1569_s0 + $0x3e8] sm:$0xff] }
  0xcd   :  { %v395_v54 = vmul.f32 %v138_v50, %v138_v50 }
  0xce   :  { %v627_v56 = vadd.f32 %v626_v53, %v372_v49  ;;  %v139_v53 = vld [vmem:[%s1569_s0 + $0x3f0] sm:$0xff] }
  0xcf   :  { %v396_v57 = vmul.f32 %v139_v53, %v139_v53 }
  0xd0   :  { %v628_v59 = vadd.f32 %v627_v56, %v373_v52  ;;  %v140_v56 = vld [vmem:[%s1569_s0 + $0x3f8] sm:$0xff] }
  0xd1   :  { %v397_v60 = vmul.f32 %v140_v56, %v140_v56 }
  0xd2   :  { %v629_v62 = vadd.f32 %v628_v59, %v374_v55  ;;  %v141_v59 = vld [vmem:[%s1569_s0 + $0x400] sm:$0xff] }
  0xd3   :  { %v398_v63 = vmul.f32 %v141_v59, %v141_v59 }
  0xd4   :  { %v630_v1 = vadd.f32 %v629_v62, %v375_v58  ;;  %v142_v62 = vld [vmem:[%s1569_s0 + $0x408] sm:$0xff] }
  0xd5   :  { %v399_v2 = vmul.f32 %v142_v62, %v142_v62 }
  0xd6   :  { %v631_v4 = vadd.f32 %v630_v1, %v376_v61  ;;  %v143_v1 = vld [vmem:[%s1569_s0 + $0x410] sm:$0xff] }
  0xd7   :  { %v400_v5 = vmul.f32 %v143_v1, %v143_v1 }
  0xd8   :  { %v632_v7 = vadd.f32 %v631_v4, %v377_v0  ;;  %v144_v4 = vld [vmem:[%s1569_s0 + $0x418] sm:$0xff] }
  0xd9   :  { %v401_v8 = vmul.f32 %v144_v4, %v144_v4 }
  0xda   :  { %v633_v10 = vadd.f32 %v632_v7, %v378_v3  ;;  %v145_v7 = vld [vmem:[%s1569_s0 + $0x420] sm:$0xff] }
  0xdb   :  { %v402_v11 = vmul.f32 %v145_v7, %v145_v7 }
  0xdc   :  { %v634_v13 = vadd.f32 %v633_v10, %v379_v6  ;;  %v146_v10 = vld [vmem:[%s1569_s0 + $0x428] sm:$0xff] }
  0xdd   :  { %v403_v14 = vmul.f32 %v146_v10, %v146_v10 }
  0xde   :  { %v635_v16 = vadd.f32 %v634_v13, %v380_v9  ;;  %v147_v13 = vld [vmem:[%s1569_s0 + $0x430] sm:$0xff] }
  0xdf   :  { %v404_v17 = vmul.f32 %v147_v13, %v147_v13 }
  0xe0   :  { %v636_v19 = vadd.f32 %v635_v16, %v381_v12  ;;  %v148_v16 = vld [vmem:[%s1569_s0 + $0x438] sm:$0xff] }
  0xe1   :  { %v405_v20 = vmul.f32 %v148_v16, %v148_v16 }
  0xe2   :  { %v637_v22 = vadd.f32 %v636_v19, %v382_v15  ;;  %v149_v19 = vld [vmem:[%s1569_s0 + $0x440] sm:$0xff] }
  0xe3   :  { %v406_v23 = vmul.f32 %v149_v19, %v149_v19 }
  0xe4   :  { %v638_v25 = vadd.f32 %v637_v22, %v383_v18  ;;  %v150_v22 = vld [vmem:[%s1569_s0 + $0x448] sm:$0xff] }
  0xe5   :  { %v407_v26 = vmul.f32 %v150_v22, %v150_v22 }
  0xe6   :  { %v639_v28 = vadd.f32 %v638_v25, %v384_v21  ;;  %v151_v25 = vld [vmem:[%s1569_s0 + $0x450] sm:$0xff] }
  0xe7   :  { %v408_v29 = vmul.f32 %v151_v25, %v151_v25 }
  0xe8   :  { %v640_v31 = vadd.f32 %v639_v28, %v385_v24  ;;  %v152_v28 = vld [vmem:[%s1569_s0 + $0x458] sm:$0xff] }
  0xe9   :  { %v409_v32 = vmul.f32 %v152_v28, %v152_v28 }
  0xea   :  { %v641_v34 = vadd.f32 %v640_v31, %v386_v27  ;;  %v153_v31 = vld [vmem:[%s1569_s0 + $0x460] sm:$0xff] }
  0xeb   :  { %v410_v35 = vmul.f32 %v153_v31, %v153_v31 }
  0xec   :  { %v642_v37 = vadd.f32 %v641_v34, %v387_v30  ;;  %v154_v34 = vld [vmem:[%s1569_s0 + $0x468] sm:$0xff] }
  0xed   :  { %v411_v38 = vmul.f32 %v154_v34, %v154_v34 }
  0xee   :  { %v643_v40 = vadd.f32 %v642_v37, %v388_v33  ;;  %v155_v37 = vld [vmem:[%s1569_s0 + $0x470] sm:$0xff] }
  0xef   :  { %v412_v41 = vmul.f32 %v155_v37, %v155_v37 }
  0xf0   :  { %v644_v43 = vadd.f32 %v643_v40, %v389_v36  ;;  %v156_v40 = vld [vmem:[%s1569_s0 + $0x478] sm:$0xff] }
  0xf1   :  { %v413_v44 = vmul.f32 %v156_v40, %v156_v40 }
  0xf2   :  { %v645_v46 = vadd.f32 %v644_v43, %v390_v39  ;;  %v157_v43 = vld [vmem:[%s1569_s0 + $0x480] sm:$0xff] }
  0xf3   :  { %v414_v47 = vmul.f32 %v157_v43, %v157_v43 }
  0xf4   :  { %v646_v49 = vadd.f32 %v645_v46, %v391_v42  ;;  %v158_v46 = vld [vmem:[%s1569_s0 + $0x488] sm:$0xff] }
  0xf5   :  { %v415_v50 = vmul.f32 %v158_v46, %v158_v46 }
  0xf6   :  { %v647_v52 = vadd.f32 %v646_v49, %v392_v45  ;;  %v159_v49 = vld [vmem:[%s1569_s0 + $0x490] sm:$0xff] }
  0xf7   :  { %v416_v53 = vmul.f32 %v159_v49, %v159_v49 }
  0xf8   :  { %v648_v55 = vadd.f32 %v647_v52, %v393_v48  ;;  %v160_v52 = vld [vmem:[%s1569_s0 + $0x498] sm:$0xff] }
  0xf9   :  { %v417_v56 = vmul.f32 %v160_v52, %v160_v52 }
  0xfa   :  { %v649_v58 = vadd.f32 %v648_v55, %v394_v51  ;;  %v161_v55 = vld [vmem:[%s1569_s0 + $0x4a0] sm:$0xff] }
  0xfb   :  { %v418_v59 = vmul.f32 %v161_v55, %v161_v55 }
  0xfc   :  { %v650_v61 = vadd.f32 %v649_v58, %v395_v54  ;;  %v162_v58 = vld [vmem:[%s1569_s0 + $0x4a8] sm:$0xff] }
  0xfd   :  { %v419_v62 = vmul.f32 %v162_v58, %v162_v58 }
  0xfe   :  { %v651_v0 = vadd.f32 %v650_v61, %v396_v57  ;;  %v163_v61 = vld [vmem:[%s1569_s0 + $0x4b0] sm:$0xff] }
  0xff   :  { %v420_v1 = vmul.f32 %v163_v61, %v163_v61 }
 0x100   :  { %v652_v3 = vadd.f32 %v651_v0, %v397_v60  ;;  %v164_v0 = vld [vmem:[%s1569_s0 + $0x4b8] sm:$0xff] }
 0x101   :  { %v421_v4 = vmul.f32 %v164_v0, %v164_v0 }
 0x102   :  { %v653_v6 = vadd.f32 %v652_v3, %v398_v63  ;;  %v165_v3 = vld [vmem:[%s1569_s0 + $0x4c0] sm:$0xff] }
 0x103   :  { %v422_v7 = vmul.f32 %v165_v3, %v165_v3 }
 0x104   :  { %v654_v9 = vadd.f32 %v653_v6, %v399_v2  ;;  %v166_v6 = vld [vmem:[%s1569_s0 + $0x4c8] sm:$0xff] }
 0x105   :  { %v423_v10 = vmul.f32 %v166_v6, %v166_v6 }
 0x106   :  { %v655_v12 = vadd.f32 %v654_v9, %v400_v5  ;;  %v167_v9 = vld [vmem:[%s1569_s0 + $0x4d0] sm:$0xff] }
 0x107   :  { %v424_v13 = vmul.f32 %v167_v9, %v167_v9 }
 0x108   :  { %v656_v15 = vadd.f32 %v655_v12, %v401_v8  ;;  %v168_v12 = vld [vmem:[%s1569_s0 + $0x4d8] sm:$0xff] }
 0x109   :  { %v425_v16 = vmul.f32 %v168_v12, %v168_v12 }
 0x10a   :  { %v657_v18 = vadd.f32 %v656_v15, %v402_v11  ;;  %v169_v15 = vld [vmem:[%s1569_s0 + $0x4e0] sm:$0xff] }
 0x10b   :  { %v426_v19 = vmul.f32 %v169_v15, %v169_v15 }
 0x10c   :  { %v658_v21 = vadd.f32 %v657_v18, %v403_v14  ;;  %v170_v18 = vld [vmem:[%s1569_s0 + $0x4e8] sm:$0xff] }
 0x10d   :  { %v427_v22 = vmul.f32 %v170_v18, %v170_v18 }
 0x10e   :  { %v659_v24 = vadd.f32 %v658_v21, %v404_v17  ;;  %v171_v21 = vld [vmem:[%s1569_s0 + $0x4f0] sm:$0xff] }
 0x10f   :  { %v428_v25 = vmul.f32 %v171_v21, %v171_v21 }
 0x110   :  { %v660_v27 = vadd.f32 %v659_v24, %v405_v20  ;;  %v172_v24 = vld [vmem:[%s1569_s0 + $0x4f8] sm:$0xff] }
 0x111   :  { %v429_v28 = vmul.f32 %v172_v24, %v172_v24 }
 0x112   :  { %v661_v30 = vadd.f32 %v660_v27, %v406_v23  ;;  %v173_v27 = vld [vmem:[%s1569_s0 + $0x500] sm:$0xff] }
 0x113   :  { %v430_v31 = vmul.f32 %v173_v27, %v173_v27 }
 0x114   :  { %v662_v33 = vadd.f32 %v661_v30, %v407_v26  ;;  %v174_v30 = vld [vmem:[%s1569_s0 + $0x508] sm:$0xff] }
 0x115   :  { %v431_v34 = vmul.f32 %v174_v30, %v174_v30 }
 0x116   :  { %v663_v36 = vadd.f32 %v662_v33, %v408_v29  ;;  %v175_v33 = vld [vmem:[%s1569_s0 + $0x510] sm:$0xff] }
 0x117   :  { %v432_v37 = vmul.f32 %v175_v33, %v175_v33 }
 0x118   :  { %v664_v39 = vadd.f32 %v663_v36, %v409_v32  ;;  %v176_v36 = vld [vmem:[%s1569_s0 + $0x518] sm:$0xff] }
 0x119   :  { %v433_v40 = vmul.f32 %v176_v36, %v176_v36 }
 0x11a   :  { %v665_v42 = vadd.f32 %v664_v39, %v410_v35  ;;  %v177_v39 = vld [vmem:[%s1569_s0 + $0x520] sm:$0xff] }
 0x11b   :  { %v434_v43 = vmul.f32 %v177_v39, %v177_v39 }
 0x11c   :  { %v666_v45 = vadd.f32 %v665_v42, %v411_v38  ;;  %v178_v42 = vld [vmem:[%s1569_s0 + $0x528] sm:$0xff] }
 0x11d   :  { %v435_v46 = vmul.f32 %v178_v42, %v178_v42 }
 0x11e   :  { %v667_v48 = vadd.f32 %v666_v45, %v412_v41  ;;  %v179_v45 = vld [vmem:[%s1569_s0 + $0x530] sm:$0xff] }
 0x11f   :  { %v436_v49 = vmul.f32 %v179_v45, %v179_v45 }
 0x120   :  { %v668_v51 = vadd.f32 %v667_v48, %v413_v44  ;;  %v180_v48 = vld [vmem:[%s1569_s0 + $0x538] sm:$0xff] }
 0x121   :  { %v437_v52 = vmul.f32 %v180_v48, %v180_v48 }
 0x122   :  { %v669_v54 = vadd.f32 %v668_v51, %v414_v47  ;;  %v181_v51 = vld [vmem:[%s1569_s0 + $0x540] sm:$0xff] }
 0x123   :  { %v438_v55 = vmul.f32 %v181_v51, %v181_v51 }
 0x124   :  { %v670_v57 = vadd.f32 %v669_v54, %v415_v50  ;;  %v182_v54 = vld [vmem:[%s1569_s0 + $0x548] sm:$0xff] }
 0x125   :  { %v439_v58 = vmul.f32 %v182_v54, %v182_v54 }
 0x126   :  { %v671_v60 = vadd.f32 %v670_v57, %v416_v53  ;;  %v183_v57 = vld [vmem:[%s1569_s0 + $0x550] sm:$0xff] }
 0x127   :  { %v440_v61 = vmul.f32 %v183_v57, %v183_v57 }
 0x128   :  { %v672_v63 = vadd.f32 %v671_v60, %v417_v56  ;;  %v184_v60 = vld [vmem:[%s1569_s0 + $0x558] sm:$0xff] }
 0x129   :  { %v441_v0 = vmul.f32 %v184_v60, %v184_v60 }
 0x12a   :  { %v673_v2 = vadd.f32 %v672_v63, %v418_v59  ;;  %v185_v63 = vld [vmem:[%s1569_s0 + $0x560] sm:$0xff] }
 0x12b   :  { %v442_v3 = vmul.f32 %v185_v63, %v185_v63 }
 0x12c   :  { %v674_v5 = vadd.f32 %v673_v2, %v419_v62  ;;  %v186_v2 = vld [vmem:[%s1569_s0 + $0x568] sm:$0xff] }
 0x12d   :  { %v443_v6 = vmul.f32 %v186_v2, %v186_v2 }
 0x12e   :  { %v675_v8 = vadd.f32 %v674_v5, %v420_v1  ;;  %v187_v5 = vld [vmem:[%s1569_s0 + $0x570] sm:$0xff] }
 0x12f   :  { %v444_v9 = vmul.f32 %v187_v5, %v187_v5 }
 0x130   :  { %v676_v11 = vadd.f32 %v675_v8, %v421_v4  ;;  %v188_v8 = vld [vmem:[%s1569_s0 + $0x578] sm:$0xff] }
 0x131   :  { %v445_v12 = vmul.f32 %v188_v8, %v188_v8 }
 0x132   :  { %v677_v14 = vadd.f32 %v676_v11, %v422_v7  ;;  %v189_v11 = vld [vmem:[%s1569_s0 + $0x580] sm:$0xff] }
 0x133   :  { %v446_v15 = vmul.f32 %v189_v11, %v189_v11 }
 0x134   :  { %v678_v17 = vadd.f32 %v677_v14, %v423_v10  ;;  %v190_v14 = vld [vmem:[%s1569_s0 + $0x588] sm:$0xff] }
 0x135   :  { %v447_v18 = vmul.f32 %v190_v14, %v190_v14 }
 0x136   :  { %v679_v20 = vadd.f32 %v678_v17, %v424_v13  ;;  %v191_v17 = vld [vmem:[%s1569_s0 + $0x590] sm:$0xff] }
 0x137   :  { %v448_v21 = vmul.f32 %v191_v17, %v191_v17 }
 0x138   :  { %v680_v23 = vadd.f32 %v679_v20, %v425_v16  ;;  %v192_v20 = vld [vmem:[%s1569_s0 + $0x598] sm:$0xff] }
 0x139   :  { %v449_v24 = vmul.f32 %v192_v20, %v192_v20 }
 0x13a   :  { %v681_v26 = vadd.f32 %v680_v23, %v426_v19  ;;  %v193_v23 = vld [vmem:[%s1569_s0 + $0x5a0] sm:$0xff] }
 0x13b   :  { %v450_v27 = vmul.f32 %v193_v23, %v193_v23 }
 0x13c   :  { %v682_v29 = vadd.f32 %v681_v26, %v427_v22  ;;  %v194_v26 = vld [vmem:[%s1569_s0 + $0x5a8] sm:$0xff] }
 0x13d   :  { %v451_v30 = vmul.f32 %v194_v26, %v194_v26 }
 0x13e   :  { %v683_v32 = vadd.f32 %v682_v29, %v428_v25  ;;  %v195_v29 = vld [vmem:[%s1569_s0 + $0x5b0] sm:$0xff] }
 0x13f   :  { %v452_v33 = vmul.f32 %v195_v29, %v195_v29 }
 0x140   :  { %v684_v35 = vadd.f32 %v683_v32, %v429_v28  ;;  %v196_v32 = vld [vmem:[%s1569_s0 + $0x5b8] sm:$0xff] }
 0x141   :  { %v453_v36 = vmul.f32 %v196_v32, %v196_v32 }
 0x142   :  { %v685_v38 = vadd.f32 %v684_v35, %v430_v31  ;;  %v197_v35 = vld [vmem:[%s1569_s0 + $0x5c0] sm:$0xff] }
 0x143   :  { %v454_v39 = vmul.f32 %v197_v35, %v197_v35 }
 0x144   :  { %v686_v41 = vadd.f32 %v685_v38, %v431_v34  ;;  %v198_v38 = vld [vmem:[%s1569_s0 + $0x5c8] sm:$0xff] }
 0x145   :  { %v455_v42 = vmul.f32 %v198_v38, %v198_v38 }
 0x146   :  { %v687_v44 = vadd.f32 %v686_v41, %v432_v37  ;;  %v199_v41 = vld [vmem:[%s1569_s0 + $0x5d0] sm:$0xff] }
 0x147   :  { %v456_v45 = vmul.f32 %v199_v41, %v199_v41 }
 0x148   :  { %v688_v47 = vadd.f32 %v687_v44, %v433_v40  ;;  %v200_v44 = vld [vmem:[%s1569_s0 + $0x5d8] sm:$0xff] }
 0x149   :  { %v457_v48 = vmul.f32 %v200_v44, %v200_v44 }
 0x14a   :  { %v689_v50 = vadd.f32 %v688_v47, %v434_v43  ;;  %v201_v47 = vld [vmem:[%s1569_s0 + $0x5e0] sm:$0xff] }
 0x14b   :  { %v458_v51 = vmul.f32 %v201_v47, %v201_v47 }
 0x14c   :  { %v690_v53 = vadd.f32 %v689_v50, %v435_v46  ;;  %v202_v50 = vld [vmem:[%s1569_s0 + $0x5e8] sm:$0xff] }
 0x14d   :  { %v459_v54 = vmul.f32 %v202_v50, %v202_v50 }
 0x14e   :  { %v691_v56 = vadd.f32 %v690_v53, %v436_v49  ;;  %v203_v53 = vld [vmem:[%s1569_s0 + $0x5f0] sm:$0xff] }
 0x14f   :  { %v460_v57 = vmul.f32 %v203_v53, %v203_v53 }
 0x150   :  { %v692_v59 = vadd.f32 %v691_v56, %v437_v52  ;;  %v204_v56 = vld [vmem:[%s1569_s0 + $0x5f8] sm:$0xff] }
 0x151   :  { %v461_v60 = vmul.f32 %v204_v56, %v204_v56 }
 0x152   :  { %v693_v62 = vadd.f32 %v692_v59, %v438_v55  ;;  %v205_v59 = vld [vmem:[%s1569_s0 + $0x600] sm:$0xff] }
 0x153   :  { %v462_v63 = vmul.f32 %v205_v59, %v205_v59 }
 0x154   :  { %v694_v1 = vadd.f32 %v693_v62, %v439_v58  ;;  %v206_v62 = vld [vmem:[%s1569_s0 + $0x608] sm:$0xff] }
 0x155   :  { %v463_v2 = vmul.f32 %v206_v62, %v206_v62 }
 0x156   :  { %v695_v4 = vadd.f32 %v694_v1, %v440_v61  ;;  %v207_v1 = vld [vmem:[%s1569_s0 + $0x610] sm:$0xff] }
 0x157   :  { %v464_v5 = vmul.f32 %v207_v1, %v207_v1 }
 0x158   :  { %v696_v7 = vadd.f32 %v695_v4, %v441_v0  ;;  %v208_v4 = vld [vmem:[%s1569_s0 + $0x618] sm:$0xff] }
 0x159   :  { %v465_v8 = vmul.f32 %v208_v4, %v208_v4 }
 0x15a   :  { %v697_v10 = vadd.f32 %v696_v7, %v442_v3  ;;  %v209_v7 = vld [vmem:[%s1569_s0 + $0x620] sm:$0xff] }
 0x15b   :  { %v466_v11 = vmul.f32 %v209_v7, %v209_v7 }
 0x15c   :  { %v698_v13 = vadd.f32 %v697_v10, %v443_v6  ;;  %v210_v10 = vld [vmem:[%s1569_s0 + $0x628] sm:$0xff] }
 0x15d   :  { %v467_v14 = vmul.f32 %v210_v10, %v210_v10 }
 0x15e   :  { %v699_v16 = vadd.f32 %v698_v13, %v444_v9  ;;  %v211_v13 = vld [vmem:[%s1569_s0 + $0x630] sm:$0xff] }
 0x15f   :  { %v468_v17 = vmul.f32 %v211_v13, %v211_v13 }
 0x160   :  { %v700_v19 = vadd.f32 %v699_v16, %v445_v12  ;;  %v212_v16 = vld [vmem:[%s1569_s0 + $0x638] sm:$0xff] }
 0x161   :  { %v469_v20 = vmul.f32 %v212_v16, %v212_v16 }
 0x162   :  { %v701_v22 = vadd.f32 %v700_v19, %v446_v15  ;;  %v213_v19 = vld [vmem:[%s1569_s0 + $0x640] sm:$0xff] }
 0x163   :  { %v470_v23 = vmul.f32 %v213_v19, %v213_v19 }
 0x164   :  { %v702_v25 = vadd.f32 %v701_v22, %v447_v18  ;;  %v214_v22 = vld [vmem:[%s1569_s0 + $0x648] sm:$0xff] }
 0x165   :  { %v471_v26 = vmul.f32 %v214_v22, %v214_v22 }
 0x166   :  { %v703_v28 = vadd.f32 %v702_v25, %v448_v21  ;;  %v215_v25 = vld [vmem:[%s1569_s0 + $0x650] sm:$0xff] }
 0x167   :  { %v472_v29 = vmul.f32 %v215_v25, %v215_v25 }
 0x168   :  { %v704_v31 = vadd.f32 %v703_v28, %v449_v24  ;;  %v216_v28 = vld [vmem:[%s1569_s0 + $0x658] sm:$0xff] }
 0x169   :  { %v473_v32 = vmul.f32 %v216_v28, %v216_v28 }
 0x16a   :  { %v705_v34 = vadd.f32 %v704_v31, %v450_v27  ;;  %v217_v31 = vld [vmem:[%s1569_s0 + $0x660] sm:$0xff] }
 0x16b   :  { %v474_v35 = vmul.f32 %v217_v31, %v217_v31 }
 0x16c   :  { %v706_v37 = vadd.f32 %v705_v34, %v451_v30  ;;  %v218_v34 = vld [vmem:[%s1569_s0 + $0x668] sm:$0xff] }
 0x16d   :  { %v475_v38 = vmul.f32 %v218_v34, %v218_v34 }
 0x16e   :  { %v707_v40 = vadd.f32 %v706_v37, %v452_v33  ;;  %v219_v37 = vld [vmem:[%s1569_s0 + $0x670] sm:$0xff] }
 0x16f   :  { %v476_v41 = vmul.f32 %v219_v37, %v219_v37 }
 0x170   :  { %v708_v43 = vadd.f32 %v707_v40, %v453_v36  ;;  %v220_v40 = vld [vmem:[%s1569_s0 + $0x678] sm:$0xff] }
 0x171   :  { %v477_v44 = vmul.f32 %v220_v40, %v220_v40 }
 0x172   :  { %v709_v46 = vadd.f32 %v708_v43, %v454_v39  ;;  %v221_v43 = vld [vmem:[%s1569_s0 + $0x680] sm:$0xff] }
 0x173   :  { %v478_v47 = vmul.f32 %v221_v43, %v221_v43 }
 0x174   :  { %v710_v49 = vadd.f32 %v709_v46, %v455_v42  ;;  %v222_v46 = vld [vmem:[%s1569_s0 + $0x688] sm:$0xff] }
 0x175   :  { %v479_v50 = vmul.f32 %v222_v46, %v222_v46 }
 0x176   :  { %v711_v52 = vadd.f32 %v710_v49, %v456_v45  ;;  %v223_v49 = vld [vmem:[%s1569_s0 + $0x690] sm:$0xff] }
 0x177   :  { %v480_v53 = vmul.f32 %v223_v49, %v223_v49 }
 0x178   :  { %v712_v55 = vadd.f32 %v711_v52, %v457_v48  ;;  %v224_v52 = vld [vmem:[%s1569_s0 + $0x698] sm:$0xff] }
 0x179   :  { %v481_v56 = vmul.f32 %v224_v52, %v224_v52 }
 0x17a   :  { %v713_v58 = vadd.f32 %v712_v55, %v458_v51  ;;  %v225_v55 = vld [vmem:[%s1569_s0 + $0x6a0] sm:$0xff] }
 0x17b   :  { %v482_v59 = vmul.f32 %v225_v55, %v225_v55 }
 0x17c   :  { %v714_v61 = vadd.f32 %v713_v58, %v459_v54  ;;  %v226_v58 = vld [vmem:[%s1569_s0 + $0x6a8] sm:$0xff] }
 0x17d   :  { %v483_v62 = vmul.f32 %v226_v58, %v226_v58 }
 0x17e   :  { %v715_v0 = vadd.f32 %v714_v61, %v460_v57  ;;  %v227_v61 = vld [vmem:[%s1569_s0 + $0x6b0] sm:$0xff] }
 0x17f   :  { %v484_v1 = vmul.f32 %v227_v61, %v227_v61 }
 0x180   :  { %v716_v3 = vadd.f32 %v715_v0, %v461_v60  ;;  %v228_v0 = vld [vmem:[%s1569_s0 + $0x6b8] sm:$0xff] }
 0x181   :  { %v485_v4 = vmul.f32 %v228_v0, %v228_v0 }
 0x182   :  { %v717_v6 = vadd.f32 %v716_v3, %v462_v63  ;;  %v229_v3 = vld [vmem:[%s1569_s0 + $0x6c0] sm:$0xff] }
 0x183   :  { %v486_v7 = vmul.f32 %v229_v3, %v229_v3 }
 0x184   :  { %v718_v9 = vadd.f32 %v717_v6, %v463_v2  ;;  %v230_v6 = vld [vmem:[%s1569_s0 + $0x6c8] sm:$0xff] }
 0x185   :  { %v487_v10 = vmul.f32 %v230_v6, %v230_v6 }
 0x186   :  { %v719_v12 = vadd.f32 %v718_v9, %v464_v5  ;;  %v231_v9 = vld [vmem:[%s1569_s0 + $0x6d0] sm:$0xff] }
 0x187   :  { %v488_v13 = vmul.f32 %v231_v9, %v231_v9 }
 0x188   :  { %v720_v15 = vadd.f32 %v719_v12, %v465_v8  ;;  %v232_v12 = vld [vmem:[%s1569_s0 + $0x6d8] sm:$0xff] }
 0x189   :  { %v489_v16 = vmul.f32 %v232_v12, %v232_v12 }
 0x18a   :  { %v721_v18 = vadd.f32 %v720_v15, %v466_v11  ;;  %v233_v15 = vld [vmem:[%s1569_s0 + $0x6e0] sm:$0xff] }
 0x18b   :  { %v490_v19 = vmul.f32 %v233_v15, %v233_v15 }
 0x18c   :  { %v722_v21 = vadd.f32 %v721_v18, %v467_v14  ;;  %v234_v18 = vld [vmem:[%s1569_s0 + $0x6e8] sm:$0xff] }
 0x18d   :  { %v491_v22 = vmul.f32 %v234_v18, %v234_v18 }
 0x18e   :  { %v723_v24 = vadd.f32 %v722_v21, %v468_v17  ;;  %v235_v21 = vld [vmem:[%s1569_s0 + $0x6f0] sm:$0xff] }
 0x18f   :  { %v492_v25 = vmul.f32 %v235_v21, %v235_v21 }
 0x190   :  { %v724_v27 = vadd.f32 %v723_v24, %v469_v20  ;;  %v236_v24 = vld [vmem:[%s1569_s0 + $0x6f8] sm:$0xff] }
 0x191   :  { %v493_v28 = vmul.f32 %v236_v24, %v236_v24 }
 0x192   :  { %v725_v30 = vadd.f32 %v724_v27, %v470_v23  ;;  %v237_v27 = vld [vmem:[%s1569_s0 + $0x700] sm:$0xff] }
 0x193   :  { %v494_v31 = vmul.f32 %v237_v27, %v237_v27 }
 0x194   :  { %v726_v33 = vadd.f32 %v725_v30, %v471_v26  ;;  %v238_v30 = vld [vmem:[%s1569_s0 + $0x708] sm:$0xff] }
 0x195   :  { %v495_v34 = vmul.f32 %v238_v30, %v238_v30 }
 0x196   :  { %v727_v36 = vadd.f32 %v726_v33, %v472_v29  ;;  %v239_v33 = vld [vmem:[%s1569_s0 + $0x710] sm:$0xff] }
 0x197   :  { %v496_v37 = vmul.f32 %v239_v33, %v239_v33 }
 0x198   :  { %v728_v39 = vadd.f32 %v727_v36, %v473_v32  ;;  %v240_v36 = vld [vmem:[%s1569_s0 + $0x718] sm:$0xff] }
 0x199   :  { %v497_v40 = vmul.f32 %v240_v36, %v240_v36 }
 0x19a   :  { %v729_v42 = vadd.f32 %v728_v39, %v474_v35  ;;  %v241_v39 = vld [vmem:[%s1569_s0 + $0x720] sm:$0xff] }
 0x19b   :  { %v498_v43 = vmul.f32 %v241_v39, %v241_v39 }
 0x19c   :  { %v730_v45 = vadd.f32 %v729_v42, %v475_v38  ;;  %v242_v42 = vld [vmem:[%s1569_s0 + $0x728] sm:$0xff] }
 0x19d   :  { %v499_v46 = vmul.f32 %v242_v42, %v242_v42 }
 0x19e   :  { %v731_v48 = vadd.f32 %v730_v45, %v476_v41  ;;  %v243_v45 = vld [vmem:[%s1569_s0 + $0x730] sm:$0xff] }
 0x19f   :  { %v500_v49 = vmul.f32 %v243_v45, %v243_v45 }
 0x1a0   :  { %v732_v51 = vadd.f32 %v731_v48, %v477_v44  ;;  %v244_v48 = vld [vmem:[%s1569_s0 + $0x738] sm:$0xff] }
 0x1a1   :  { %v501_v52 = vmul.f32 %v244_v48, %v244_v48 }
 0x1a2   :  { %v733_v54 = vadd.f32 %v732_v51, %v478_v47  ;;  %v245_v51 = vld [vmem:[%s1569_s0 + $0x740] sm:$0xff] }
 0x1a3   :  { %v502_v55 = vmul.f32 %v245_v51, %v245_v51 }
 0x1a4   :  { %v734_v57 = vadd.f32 %v733_v54, %v479_v50  ;;  %v246_v54 = vld [vmem:[%s1569_s0 + $0x748] sm:$0xff] }
 0x1a5   :  { %v503_v58 = vmul.f32 %v246_v54, %v246_v54 }
 0x1a6   :  { %v735_v60 = vadd.f32 %v734_v57, %v480_v53  ;;  %v247_v57 = vld [vmem:[%s1569_s0 + $0x750] sm:$0xff] }
 0x1a7   :  { %v504_v61 = vmul.f32 %v247_v57, %v247_v57 }
 0x1a8   :  { %v736_v63 = vadd.f32 %v735_v60, %v481_v56  ;;  %v248_v60 = vld [vmem:[%s1569_s0 + $0x758] sm:$0xff] }
 0x1a9   :  { %v505_v0 = vmul.f32 %v248_v60, %v248_v60 }
 0x1aa   :  { %v737_v2 = vadd.f32 %v736_v63, %v482_v59  ;;  %v249_v63 = vld [vmem:[%s1569_s0 + $0x760] sm:$0xff] }
 0x1ab   :  { %v506_v3 = vmul.f32 %v249_v63, %v249_v63 }
 0x1ac   :  { %v738_v5 = vadd.f32 %v737_v2, %v483_v62  ;;  %v250_v2 = vld [vmem:[%s1569_s0 + $0x768] sm:$0xff] }
 0x1ad   :  { %v507_v6 = vmul.f32 %v250_v2, %v250_v2 }
 0x1ae   :  { %v739_v8 = vadd.f32 %v738_v5, %v484_v1  ;;  %v251_v5 = vld [vmem:[%s1569_s0 + $0x770] sm:$0xff] }
 0x1af   :  { %v508_v9 = vmul.f32 %v251_v5, %v251_v5 }
 0x1b0   :  { %v740_v11 = vadd.f32 %v739_v8, %v485_v4  ;;  %v252_v8 = vld [vmem:[%s1569_s0 + $0x778] sm:$0xff] }
 0x1b1   :  { %v509_v12 = vmul.f32 %v252_v8, %v252_v8 }
 0x1b2   :  { %v741_v14 = vadd.f32 %v740_v11, %v486_v7  ;;  %v253_v11 = vld [vmem:[%s1569_s0 + $0x780] sm:$0xff] }
 0x1b3   :  { %v510_v15 = vmul.f32 %v253_v11, %v253_v11 }
 0x1b4   :  { %v742_v17 = vadd.f32 %v741_v14, %v487_v10  ;;  %v254_v14 = vld [vmem:[%s1569_s0 + $0x788] sm:$0xff] }
 0x1b5   :  { %v511_v18 = vmul.f32 %v254_v14, %v254_v14 }
 0x1b6   :  { %v743_v20 = vadd.f32 %v742_v17, %v488_v13  ;;  %v255_v17 = vld [vmem:[%s1569_s0 + $0x790] sm:$0xff] }
 0x1b7   :  { %v512_v21 = vmul.f32 %v255_v17, %v255_v17 }
 0x1b8   :  { %v744_v23 = vadd.f32 %v743_v20, %v489_v16  ;;  %v256_v20 = vld [vmem:[%s1569_s0 + $0x798] sm:$0xff] }
 0x1b9   :  { %v513_v24 = vmul.f32 %v256_v20, %v256_v20 }
 0x1ba   :  { %v745_v26 = vadd.f32 %v744_v23, %v490_v19  ;;  %v257_v23 = vld [vmem:[%s1569_s0 + $0x7a0] sm:$0xff] }
 0x1bb   :  { %v514_v27 = vmul.f32 %v257_v23, %v257_v23 }
 0x1bc   :  { %v746_v29 = vadd.f32 %v745_v26, %v491_v22  ;;  %v258_v26 = vld [vmem:[%s1569_s0 + $0x7a8] sm:$0xff] }
 0x1bd   :  { %v515_v30 = vmul.f32 %v258_v26, %v258_v26 }
 0x1be   :  { %v747_v32 = vadd.f32 %v746_v29, %v492_v25  ;;  %v259_v29 = vld [vmem:[%s1569_s0 + $0x7b0] sm:$0xff] }
 0x1bf   :  { %v516_v33 = vmul.f32 %v259_v29, %v259_v29 }
 0x1c0   :  { %v748_v35 = vadd.f32 %v747_v32, %v493_v28  ;;  %v260_v32 = vld [vmem:[%s1569_s0 + $0x7b8] sm:$0xff] }
 0x1c1   :  { %v517_v36 = vmul.f32 %v260_v32, %v260_v32 }
 0x1c2   :  { %v749_v38 = vadd.f32 %v748_v35, %v494_v31  ;;  %v261_v35 = vld [vmem:[%s1569_s0 + $0x7c0] sm:$0xff] }
 0x1c3   :  { %v518_v39 = vmul.f32 %v261_v35, %v261_v35 }
 0x1c4   :  { %v750_v41 = vadd.f32 %v749_v38, %v495_v34  ;;  %v262_v38 = vld [vmem:[%s1569_s0 + $0x7c8] sm:$0xff] }
 0x1c5   :  { %v519_v42 = vmul.f32 %v262_v38, %v262_v38 }
 0x1c6   :  { %v751_v44 = vadd.f32 %v750_v41, %v496_v37  ;;  %v263_v41 = vld [vmem:[%s1569_s0 + $0x7d0] sm:$0xff] }
 0x1c7   :  { %v520_v45 = vmul.f32 %v263_v41, %v263_v41 }
 0x1c8   :  { %v752_v47 = vadd.f32 %v751_v44, %v497_v40  ;;  %v264_v44 = vld [vmem:[%s1569_s0 + $0x7d8] sm:$0xff] }
 0x1c9   :  { %v521_v48 = vmul.f32 %v264_v44, %v264_v44 }
 0x1ca   :  { %v753_v50 = vadd.f32 %v752_v47, %v498_v43  ;;  %v265_v47 = vld [vmem:[%s1569_s0 + $0x7e0] sm:$0xff] }
 0x1cb   :  { %v522_v51 = vmul.f32 %v265_v47, %v265_v47 }
 0x1cc   :  { %v754_v53 = vadd.f32 %v753_v50, %v499_v46  ;;  %v266_v50 = vld [vmem:[%s1569_s0 + $0x7e8] sm:$0xff] }
 0x1cd   :  { %v523_v54 = vmul.f32 %v266_v50, %v266_v50 }
 0x1ce   :  { %v755_v56 = vadd.f32 %v754_v53, %v500_v49  ;;  %v267_v53 = vld [vmem:[%s1569_s0 + $0x7f0] sm:$0xff] }
 0x1cf   :  { %v524_v57 = vmul.f32 %v267_v53, %v267_v53 }
 0x1d0   :  { %v756_v59 = vadd.f32 %v755_v56, %v501_v52  ;;  %v268_v56 = vld [vmem:[%s1569_s0 + $0x7f8] sm:$0xff] }
 0x1d2   :  { %v757_v62 = vadd.f32 %v756_v59, %v502_v55  ;;  %v525_v59 = vmul.f32 %v268_v56, %v268_v56 }
 0x1d4   :  { %v758_v1 = vadd.f32 %v757_v62, %v503_v58 }
 0x1d6   :  { %v759_v4 = vadd.f32 %v758_v1, %v504_v61 }
 0x1d8   :  { %v760_v7 = vadd.f32 %v759_v4, %v505_v0 }
 0x1da   :  { %v761_v10 = vadd.f32 %v760_v7, %v506_v3 }
 0x1dc   :  { %v762_v13 = vadd.f32 %v761_v10, %v507_v6 }
 0x1de   :  { %v763_v16 = vadd.f32 %v762_v13, %v508_v9 }
 0x1e0   :  { %v764_v19 = vadd.f32 %v763_v16, %v509_v12 }
 0x1e2   :  { %v765_v22 = vadd.f32 %v764_v19, %v510_v15 }
 0x1e4   :  { %v766_v25 = vadd.f32 %v765_v22, %v511_v18 }
 0x1e6   :  { %v767_v28 = vadd.f32 %v766_v25, %v512_v21 }
 0x1e8   :  { %v768_v31 = vadd.f32 %v767_v28, %v513_v24 }
 0x1ea   :  { %v769_v34 = vadd.f32 %v768_v31, %v514_v27 }
 0x1ec   :  { %v770_v37 = vadd.f32 %v769_v34, %v515_v30 }
 0x1ee   :  { %v771_v40 = vadd.f32 %v770_v37, %v516_v33 }
 0x1f0   :  { %v772_v43 = vadd.f32 %v771_v40, %v517_v36 }
 0x1f2   :  { %v773_v46 = vadd.f32 %v772_v43, %v518_v39 }
 0x1f4   :  { %v774_v49 = vadd.f32 %v773_v46, %v519_v42 }
 0x1f6   :  { %v775_v52 = vadd.f32 %v774_v49, %v520_v45 }
 0x1f8   :  { %v776_v55 = vadd.f32 %v775_v52, %v521_v48 }
 0x1fa   :  { %v777_v58 = vadd.f32 %v776_v55, %v522_v51 }
 0x1fc   :  { %v778_v60 = vadd.f32 %v777_v58, %v523_v54 }
 0x1fe   :  { %v779_v61 = vadd.f32 %v778_v60, %v524_v57 }
 0x200   :  { %v780_v62 = vadd.f32 %v779_v61, %v525_v59 }
 0x202   :  { %782 = vst [vmem:[%s1570_s1] sm:$0xff] %v780_v62 }

</bundles_post_ra>
